<compile_context>
chip_gen: v5e
topology: v5e:2x2
jax: 0.10.0
libtpu: 0.0.40
codegen_flags: <defaults>
</compile_context>

<pallas_src>
import functools

import jax
import jax.numpy as jnp
from jax.experimental import pallas as pl
from jax.experimental.pallas import tpu as pltpu

LANE = 128   # padded feature width (lane-dense)
TM = 128     # A row tile
TK = 128     # A column (reduction) tile


# ---------------------------------------------------------------------------
# Kernel: one GCN layer = SpMM(A, H) accumulated over K tiles, then
# finalize: relu(acc @ W + b) [optionally followed by the fused final Linear].
# ---------------------------------------------------------------------------
def _gcn_layer_kernel(a_ref, h_ref, w_ref, b_ref, *rest, fuse_final):
    if fuse_final:
        wf_ref, bf_ref, o_ref, acc_ref = rest
    else:
        o_ref, acc_ref = rest

    k = pl.program_id(1)

    @pl.when(k == 0)
    def _():
        acc_ref[...] = jnp.zeros_like(acc_ref)

    # SpMM partial sum on the MXU: acc += A[i, k] @ H[k, :]  (bf16 in, f32 acc)
    acc_ref[...] += jnp.dot(a_ref[...], h_ref[...],
                            preferred_element_type=jnp.float32)

    @pl.when(k == pl.num_programs(1) - 1)
    def _():
        # Dense per-row-tile feature transform + bias + ReLU (f32 elementwise).
        h = jnp.dot(acc_ref[...].astype(jnp.bfloat16), w_ref[...],
                    preferred_element_type=jnp.float32) + b_ref[...]
        h = jnp.maximum(h, 0.0)
        if fuse_final:
            o_ref[...] = (jnp.dot(h.astype(jnp.bfloat16), wf_ref[...],
                                  preferred_element_type=jnp.float32)
                          + bf_ref[...]).astype(o_ref.dtype)
        else:
            o_ref[...] = h.astype(o_ref.dtype)


def _gcn_layer(a, h_in, w, b, wf=None, bf=None, *, out_dtype):
    n_pad = a.shape[0]
    fuse_final = wf is not None
    grid = (n_pad // TM, n_pad // TK)

    def const_spec(shape):
        # Constant block index -> fetched once, VMEM-resident across the grid.
        return pl.BlockSpec(shape, lambda i, k: (0, 0))

    in_specs = [
        pl.BlockSpec((TM, TK), lambda i, k: (i, k)),      # A tile
        pl.BlockSpec((TK, LANE), lambda i, k: (k, 0)),    # activation tile
        const_spec((LANE, LANE)),                         # W
        const_spec((1, LANE)),                            # b
    ]
    args = [a, h_in, w, b]
    if fuse_final:
        in_specs += [const_spec((LANE, LANE)), const_spec((1, LANE))]
        args += [wf, bf]

    n_mats = 2 if fuse_final else 1
    flops = 2 * n_pad * n_pad * LANE + 2 * n_pad * LANE * LANE * n_mats
    bytes_accessed = (a.size * a.dtype.itemsize
                      + h_in.size * h_in.dtype.itemsize
                      + n_pad * LANE * jnp.dtype(out_dtype).itemsize)

    kernel = functools.partial(_gcn_layer_kernel, fuse_final=fuse_final)

    return pl.pallas_call(
        kernel,
        out_shape=jax.ShapeDtypeStruct((n_pad, LANE), out_dtype),
        grid_spec=pltpu.PrefetchScalarGridSpec(
            num_scalar_prefetch=0,
            grid=grid,
            in_specs=in_specs,
            out_specs=pl.BlockSpec((TM, LANE), lambda i, k: (i, 0)),
            scratch_shapes=[pltpu.VMEM((TM, LANE), jnp.float32)],
        ),
        compiler_params=pltpu.CompilerParams(
            dimension_semantics=("parallel", "arbitrary"),
            vmem_limit_bytes=32 * 1024 * 1024,
        ),
        cost_estimate=pl.CostEstimate(flops=flops, transcendentals=0,
                                      bytes_accessed=bytes_accessed),
    )(*args)


# ---------------------------------------------------------------------------
# Wrapper: pad to lane-dense / tile-aligned shapes, run the two fused layers,
# slice the real rows/classes back out.
# ---------------------------------------------------------------------------
def _pad2(x, rows, cols, dtype):
    out = jnp.zeros((rows, cols), dtype)
    return out.at[:x.shape[0], :x.shape[1]].set(x.astype(dtype))


def gcn_forward(a_hat, x, w1, b1, w2, b2, wf, bf):
    n, _ = x.shape
    c = wf.shape[1]
    n_pad = max(pl.cdiv(n, TM) * TM, TM)     # TM == TK, so aligned for both

    # Zero-padded, lane-dense operands; bf16 for MXU inputs, biases stay f32.
    a_p = _pad2(a_hat, n_pad, n_pad, jnp.bfloat16)
    x_p = _pad2(x, n_pad, LANE, jnp.bfloat16)
    w1_p = _pad2(w1, LANE, LANE, jnp.bfloat16)
    w2_p = _pad2(w2, LANE, LANE, jnp.bfloat16)
    wf_p = _pad2(wf, LANE, LANE, jnp.bfloat16)
    b1_p = _pad2(b1, 1, LANE, jnp.float32)
    b2_p = _pad2(b2, 1, LANE, jnp.float32)
    bf_p = _pad2(bf, 1, LANE, jnp.float32)

    # Layer 1: relu((A @ X) @ W1 + b1)         -> (n_pad, 128) bf16
    h1 = _gcn_layer(a_p, x_p, w1_p, b1_p, out_dtype=jnp.bfloat16)
    # Layer 2 + fused fc: relu((A @ H1) @ W2 + b2) @ Wf + bf -> (n_pad, 128) f32
    out = _gcn_layer(a_p, h1, w2_p, b2_p, wf_p, bf_p, out_dtype=jnp.float32)
    return out[:n, :c]


gcn_forward_jit = jax.jit(gcn_forward)


# ---------------------------------------------------------------------------
# Glue (plain JAX): dense symmetric-normalized adjacency matching PyG's
# gcn_norm (add self-loops with weight 1, D^-1/2 (A + I) D^-1/2).
# ---------------------------------------------------------------------------
def build_norm_adj(edge_index, edge_weight, num_nodes):
    src = edge_index[0]
    dst = edge_index[1]
    loop = jnp.arange(num_nodes, dtype=edge_index.dtype)
    src = jnp.concatenate([src, loop])
    dst = jnp.concatenate([dst, loop])
    w = jnp.concatenate([edge_weight,
                         jnp.ones((num_nodes,), edge_weight.dtype)])
    deg = jnp.zeros((num_nodes,), w.dtype).at[dst].add(w)
    dinv = jnp.where(deg > 0, 1.0 / jnp.sqrt(deg), 0.0)
    norm = dinv[src] * w * dinv[dst]
    # Aggregation at the target node: out[dst] += norm * x[src] => A[dst, src]
    a = jnp.zeros((num_nodes, num_nodes), w.dtype).at[dst, src].add(norm)
    return a


if __name__ == "__main__":
    # Small synthetic graph consistent with the module's forward:
    #   data.x: (N, input_dim), data.edge_index: (2, E), data.edge_attr: (E,)
    N, input_dim, hidden, output_dim, E = 250, 32, 64, 5, 700

    key = jax.random.PRNGKey(0)
    kx, ke, kw, k1, k2, k3, kb1, kb2, kb3 = jax.random.split(key, 9)

    x = jax.random.normal(kx, (N, input_dim), dtype=jnp.float32)
    edge_index = jax.random.randint(ke, (2, E), 0, N, dtype=jnp.int32)
    edge_attr = jax.random.uniform(kw, (E,), dtype=jnp.float32)  # in [0, 1]

    w1 = 0.1 * jax.random.normal(k1, (input_dim, hidden), dtype=jnp.float32)
    b1 = 0.1 * jax.random.normal(kb1, (1, hidden), dtype=jnp.float32)
    w2 = 0.1 * jax.random.normal(k2, (hidden, hidden), dtype=jnp.float32)
    b2 = 0.1 * jax.random.normal(kb2, (1, hidden), dtype=jnp.float32)
    wf = 0.1 * jax.random.normal(k3, (hidden, output_dim), dtype=jnp.float32)
    bf = 0.1 * jax.random.normal(kb3, (1, output_dim), dtype=jnp.float32)

    a_hat = build_norm_adj(edge_index, edge_attr, N)

    out = gcn_forward_jit(a_hat, x, w1, b1, w2, b2, wf, bf)
    out = jax.block_until_ready(out)
    assert out.shape == (N, output_dim)

    # Tight check vs. a reference that mimics the kernel's bf16/f32 mixed path.
    ab = a_hat.astype(jnp.bfloat16)
    xb = x.astype(jnp.bfloat16)
    acc1 = jnp.dot(ab, xb, preferred_element_type=jnp.float32)
    h1 = jnp.maximum(jnp.dot(acc1.astype(jnp.bfloat16), w1.astype(jnp.bfloat16),
                             preferred_element_type=jnp.float32) + b1, 0.0)
    acc2 = jnp.dot(ab, h1.astype(jnp.bfloat16), preferred_element_type=jnp.float32)
    h2 = jnp.maximum(jnp.dot(acc2.astype(jnp.bfloat16), w2.astype(jnp.bfloat16),
                             preferred_element_type=jnp.float32) + b2, 0.0)
    ref_mixed = jnp.dot(h2.astype(jnp.bfloat16), wf.astype(jnp.bfloat16),
                        preferred_element_type=jnp.float32) + bf
    assert jnp.allclose(out, ref_mixed, atol=1e-2, rtol=1e-2)

    # Loose semantic check vs. the pure-f32 GCN math of the original module.
    ref = jnp.maximum(a_hat @ (x @ w1) + b1, 0.0)
    ref = jnp.maximum(a_hat @ (ref @ w2) + b2, 0.0)
    ref = ref @ wf + bf
    assert jnp.allclose(out, ref, atol=5e-2, rtol=5e-2)

    print("KERNEL_OK")
</pallas_src>

<mosaic_0001>
module attributes {stable_mosaic.version = 11 : i64} {
  func.func @_gcn_layer_kernel(%arg0: i32, %arg1: i32, %arg2: memref<128x128xbf16, #tpu.memory_space<vmem>>, %arg3: memref<128x128xbf16, #tpu.memory_space<vmem>>, %arg4: memref<128x128xbf16, #tpu.memory_space<vmem>>, %arg5: memref<1x128xf32, #tpu.memory_space<vmem>>, %arg6: memref<128x128xbf16, #tpu.memory_space<vmem>>, %arg7: memref<128x128xf32, #tpu.memory_space<vmem>>) attributes {dimension_semantics = [#tpu.dimension_semantics<parallel>, #tpu.dimension_semantics<arbitrary>], iteration_bounds = array<i64: 2, 2>, scalar_prefetch = 0 : i64, scratch_operands = 1 : i64, tpu.core_type = #tpu.core_type<tc>, window_params = [{transform_indices = @transform_0, window_bounds = array<i64: 128, 128>}, {transform_indices = @transform_1, window_bounds = array<i64: 128, 128>}, {pipeline_mode = #tpu.pipeline_mode<synchronous>, transform_indices = @transform_2, window_bounds = array<i64: 128, 128>}, {pipeline_mode = #tpu.pipeline_mode<synchronous>, transform_indices = @transform_3, window_bounds = array<i64: 1, 128>}, {transform_indices = @transform_4, window_bounds = array<i64: 128, 128>}]} {
    %c0_i32 = arith.constant 0 : i32
    %0 = arith.cmpi eq, %arg1, %c0_i32 : i32
    %1 = arith.extui %0 : i1 to i32
    %c0_i32_0 = arith.constant 0 : i32
    %2 = arith.cmpi ne, %1, %c0_i32_0 : i32
    scf.if %2 {
      %cst_9 = arith.constant 0.000000e+00 : f32
      %12 = vector.broadcast %cst_9 : f32 to vector<128x128xf32>
      %c0_10 = arith.constant 0 : index
      %c0_11 = arith.constant 0 : index
      %13 = vector.load %arg7[%c0_10, %c0_11] : memref<128x128xf32, #tpu.memory_space<vmem>>, vector<128x128xf32>
      tpu.vector_store %arg7[%c0_10, %c0_11], %12 {strides = array<i32>} : memref<128x128xf32, #tpu.memory_space<vmem>>, vector<128x128xf32>,
    } else {
    }
    %c0 = arith.constant 0 : index
    %c0_1 = arith.constant 0 : index
    %3 = vector.load %arg7[%c0, %c0_1] : memref<128x128xf32, #tpu.memory_space<vmem>>, vector<128x128xf32>
    %c0_2 = arith.constant 0 : index
    %c0_3 = arith.constant 0 : index
    %4 = vector.load %arg2[%c0_2, %c0_3] : memref<128x128xbf16, #tpu.memory_space<vmem>>, vector<128x128xbf16>
    %c0_4 = arith.constant 0 : index
    %c0_5 = arith.constant 0 : index
    %5 = vector.load %arg3[%c0_4, %c0_5] : memref<128x128xbf16, #tpu.memory_space<vmem>>, vector<128x128xbf16>
    %cst = arith.constant dense<0.000000e+00> : vector<128x128xf32>
    %6 = tpu.matmul %4, %5, %cst {dimension_numbers = #tpu.dot_dimension_numbers<[1], [0], [0], [1], [0, 0, 1, 1], [], []>} : vector<128x128xbf16>, vector<128x128xbf16>, vector<128x128xf32> -> vector<128x128xf32>
    %7 = arith.addf %3, %6 : vector<128x128xf32>
    %c0_6 = arith.constant 0 : index
    %c0_7 = arith.constant 0 : index
    %8 = vector.load %arg7[%c0_6, %c0_7] : memref<128x128xf32, #tpu.memory_space<vmem>>, vector<128x128xf32>
    tpu.vector_store %arg7[%c0_6, %c0_7], %7 {strides = array<i32>} : memref<128x128xf32, #tpu.memory_space<vmem>>, vector<128x128xf32>,
    %c1_i32 = arith.constant 1 : i32
    %9 = arith.cmpi eq, %arg1, %c1_i32 : i32
    %10 = arith.extui %9 : i1 to i32
    %c0_i32_8 = arith.constant 0 : i32
    %11 = arith.cmpi ne, %10, %c0_i32_8 : i32
    scf.if %11 {
      %c0_9 = arith.constant 0 : index
      %c0_10 = arith.constant 0 : index
      %12 = vector.load %arg7[%c0_9, %c0_10] : memref<128x128xf32, #tpu.memory_space<vmem>>, vector<128x128xf32>
      %13 = arith.truncf %12 : vector<128x128xf32> to vector<128x128xbf16>
      %c0_11 = arith.constant 0 : index
      %c0_12 = arith.constant 0 : index
      %14 = vector.load %arg4[%c0_11, %c0_12] : memref<128x128xbf16, #tpu.memory_space<vmem>>, vector<128x128xbf16>
      %cst_13 = arith.constant dense<0.000000e+00> : vector<128x128xf32>
      %15 = tpu.matmul %13, %14, %cst_13 {dimension_numbers = #tpu.dot_dimension_numbers<[1], [0], [0], [1], [0, 0, 1, 1], [], []>} : vector<128x128xbf16>, vector<128x128xbf16>, vector<128x128xf32> -> vector<128x128xf32>
      %c0_14 = arith.constant 0 : index
      %c0_15 = arith.constant 0 : index
      %16 = vector.load %arg5[%c0_14, %c0_15] : memref<1x128xf32, #tpu.memory_space<vmem>>, vector<1x128xf32>
      %17 = vector.broadcast %16 : vector<1x128xf32> to vector<128x128xf32>
      %18 = arith.addf %15, %17 : vector<128x128xf32>
      %cst_16 = arith.constant 0.000000e+00 : f32
      %19 = vector.broadcast %cst_16 : f32 to vector<128x128xf32>
      %20 = arith.maximumf %18, %19 : vector<128x128xf32>
      %21 = arith.truncf %20 : vector<128x128xf32> to vector<128x128xbf16>
      %c0_17 = arith.constant 0 : index
      %c0_18 = arith.constant 0 : index
      %22 = vector.load %arg6[%c0_17, %c0_18] : memref<128x128xbf16, #tpu.memory_space<vmem>>, vector<128x128xbf16>
      tpu.vector_store %arg6[%c0_17, %c0_18], %21 {strides = array<i32>} : memref<128x128xbf16, #tpu.memory_space<vmem>>, vector<128x128xbf16>,
    } else {
    }
    return
  }
  func.func @transform_0(%arg0: i32, %arg1: i32) -> (i32, i32) {
    %c0_i32 = arith.constant 0 : i32
    return %arg0, %arg1 : i32, i32
  }
  func.func @transform_1(%arg0: i32, %arg1: i32) -> (i32, i32) {
    %c0_i32 = arith.constant 0 : i32
    %c0_i32_0 = arith.constant 0 : i32
    return %arg1, %c0_i32 : i32, i32
  }
  func.func @transform_2(%arg0: i32, %arg1: i32) -> (i32, i32) {
    %c0_i32 = arith.constant 0 : i32
    %c0_i32_0 = arith.constant 0 : i32
    %c0_i32_1 = arith.constant 0 : i32
    return %c0_i32, %c0_i32_0 : i32, i32
  }
  func.func @transform_3(%arg0: i32, %arg1: i32) -> (i32, i32) {
    %c0_i32 = arith.constant 0 : i32
    %c0_i32_0 = arith.constant 0 : i32
    %c0_i32_1 = arith.constant 0 : i32
    return %c0_i32, %c0_i32_0 : i32, i32
  }
  func.func @transform_4(%arg0: i32, %arg1: i32) -> (i32, i32) {
    %c0_i32 = arith.constant 0 : i32
    %c0_i32_0 = arith.constant 0 : i32
    return %arg0, %c0_i32 : i32, i32
  }
}

module attributes {stable_mosaic.version = 11 : i64} {
  func.func @_gcn_layer_kernel(%arg0: i32, %arg1: i32, %arg2: memref<128x128xbf16, #tpu.memory_space<vmem>>, %arg3: memref<128x128xbf16, #tpu.memory_space<vmem>>, %arg4: memref<128x128xbf16, #tpu.memory_space<vmem>>, %arg5: memref<1x128xf32, #tpu.memory_space<vmem>>, %arg6: memref<128x128xbf16, #tpu.memory_space<vmem>>, %arg7: memref<1x128xf32, #tpu.memory_space<vmem>>, %arg8: memref<128x128xf32, #tpu.memory_space<vmem>>, %arg9: memref<128x128xf32, #tpu.memory_space<vmem>>) attributes {dimension_semantics = [#tpu.dimension_semantics<parallel>, #tpu.dimension_semantics<arbitrary>], iteration_bounds = array<i64: 2, 2>, scalar_prefetch = 0 : i64, scratch_operands = 1 : i64, tpu.core_type = #tpu.core_type<tc>, window_params = [{transform_indices = @transform_0, window_bounds = array<i64: 128, 128>}, {transform_indices = @transform_1, window_bounds = array<i64: 128, 128>}, {pipeline_mode = #tpu.pipeline_mode<synchronous>, transform_indices = @transform_2, window_bounds = array<i64: 128, 128>}, {pipeline_mode = #tpu.pipeline_mode<synchronous>, transform_indices = @transform_3, window_bounds = array<i64: 1, 128>}, {pipeline_mode = #tpu.pipeline_mode<synchronous>, transform_indices = @transform_4, window_bounds = array<i64: 128, 128>}, {pipeline_mode = #tpu.pipeline_mode<synchronous>, transform_indices = @transform_5, window_bounds = array<i64: 1, 128>}, {transform_indices = @transform_6, window_bounds = array<i64: 128, 128>}]} {
    %c0_i32 = arith.constant 0 : i32
    %0 = arith.cmpi eq, %arg1, %c0_i32 : i32
    %1 = arith.extui %0 : i1 to i32
    %c0_i32_0 = arith.constant 0 : i32
    %2 = arith.cmpi ne, %1, %c0_i32_0 : i32
    scf.if %2 {
      %cst_9 = arith.constant 0.000000e+00 : f32
      %12 = vector.broadcast %cst_9 : f32 to vector<128x128xf32>
      %c0_10 = arith.constant 0 : index
      %c0_11 = arith.constant 0 : index
      %13 = vector.load %arg9[%c0_10, %c0_11] : memref<128x128xf32, #tpu.memory_space<vmem>>, vector<128x128xf32>
      tpu.vector_store %arg9[%c0_10, %c0_11], %12 {strides = array<i32>} : memref<128x128xf32, #tpu.memory_space<vmem>>, vector<128x128xf32>,
    } else {
    }
    %c0 = arith.constant 0 : index
    %c0_1 = arith.constant 0 : index
    %3 = vector.load %arg9[%c0, %c0_1] : memref<128x128xf32, #tpu.memory_space<vmem>>, vector<128x128xf32>
    %c0_2 = arith.constant 0 : index
    %c0_3 = arith.constant 0 : index
    %4 = vector.load %arg2[%c0_2, %c0_3] : memref<128x128xbf16, #tpu.memory_space<vmem>>, vector<128x128xbf16>
    %c0_4 = arith.constant 0 : index
    %c0_5 = arith.constant 0 : index
    %5 = vector.load %arg3[%c0_4, %c0_5] : memref<128x128xbf16, #tpu.memory_space<vmem>>, vector<128x128xbf16>
    %cst = arith.constant dense<0.000000e+00> : vector<128x128xf32>
    %6 = tpu.matmul %4, %5, %cst {dimension_numbers = #tpu.dot_dimension_numbers<[1], [0], [0], [1], [0, 0, 1, 1], [], []>} : vector<128x128xbf16>, vector<128x128xbf16>, vector<128x128xf32> -> vector<128x128xf32>
    %7 = arith.addf %3, %6 : vector<128x128xf32>
    %c0_6 = arith.constant 0 : index
    %c0_7 = arith.constant 0 : index
    %8 = vector.load %arg9[%c0_6, %c0_7] : memref<128x128xf32, #tpu.memory_space<vmem>>, vector<128x128xf32>
    tpu.vector_store %arg9[%c0_6, %c0_7], %7 {strides = array<i32>} : memref<128x128xf32, #tpu.memory_space<vmem>>, vector<128x128xf32>,
    %c1_i32 = arith.constant 1 : i32
    %9 = arith.cmpi eq, %arg1, %c1_i32 : i32
    %10 = arith.extui %9 : i1 to i32
    %c0_i32_8 = arith.constant 0 : i32
    %11 = arith.cmpi ne, %10, %c0_i32_8 : i32
    scf.if %11 {
      %c0_9 = arith.constant 0 : index
      %c0_10 = arith.constant 0 : index
      %12 = vector.load %arg9[%c0_9, %c0_10] : memref<128x128xf32, #tpu.memory_space<vmem>>, vector<128x128xf32>
      %13 = arith.truncf %12 : vector<128x128xf32> to vector<128x128xbf16>
      %c0_11 = arith.constant 0 : index
      %c0_12 = arith.constant 0 : index
      %14 = vector.load %arg4[%c0_11, %c0_12] : memref<128x128xbf16, #tpu.memory_space<vmem>>, vector<128x128xbf16>
      %cst_13 = arith.constant dense<0.000000e+00> : vector<128x128xf32>
      %15 = tpu.matmul %13, %14, %cst_13 {dimension_numbers = #tpu.dot_dimension_numbers<[1], [0], [0], [1], [0, 0, 1, 1], [], []>} : vector<128x128xbf16>, vector<128x128xbf16>, vector<128x128xf32> -> vector<128x128xf32>
      %c0_14 = arith.constant 0 : index
      %c0_15 = arith.constant 0 : index
      %16 = vector.load %arg5[%c0_14, %c0_15] : memref<1x128xf32, #tpu.memory_space<vmem>>, vector<1x128xf32>
      %17 = vector.broadcast %16 : vector<1x128xf32> to vector<128x128xf32>
      %18 = arith.addf %15, %17 : vector<128x128xf32>
      %cst_16 = arith.constant 0.000000e+00 : f32
      %19 = vector.broadcast %cst_16 : f32 to vector<128x128xf32>
      %20 = arith.maximumf %18, %19 : vector<128x128xf32>
      %21 = arith.truncf %20 : vector<128x128xf32> to vector<128x128xbf16>
      %c0_17 = arith.constant 0 : index
      %c0_18 = arith.constant 0 : index
      %22 = vector.load %arg6[%c0_17, %c0_18] : memref<128x128xbf16, #tpu.memory_space<vmem>>, vector<128x128xbf16>
      %cst_19 = arith.constant dense<0.000000e+00> : vector<128x128xf32>
      %23 = tpu.matmul %21, %22, %cst_19 {dimension_numbers = #tpu.dot_dimension_numbers<[1], [0], [0], [1], [0, 0, 1, 1], [], []>} : vector<128x128xbf16>, vector<128x128xbf16>, vector<128x128xf32> -> vector<128x128xf32>
      %c0_20 = arith.constant 0 : index
      %c0_21 = arith.constant 0 : index
      %24 = vector.load %arg7[%c0_20, %c0_21] : memref<1x128xf32, #tpu.memory_space<vmem>>, vector<1x128xf32>
      %25 = vector.broadcast %24 : vector<1x128xf32> to vector<128x128xf32>
      %26 = arith.addf %23, %25 : vector<128x128xf32>
      %c0_22 = arith.constant 0 : index
      %c0_23 = arith.constant 0 : index
      %27 = vector.load %arg8[%c0_22, %c0_23] : memref<128x128xf32, #tpu.memory_space<vmem>>, vector<128x128xf32>
      tpu.vector_store %arg8[%c0_22, %c0_23], %26 {strides = array<i32>} : memref<128x128xf32, #tpu.memory_space<vmem>>, vector<128x128xf32>,
    } else {
    }
    return
  }
  func.func @transform_0(%arg0: i32, %arg1: i32) -> (i32, i32) {
    %c0_i32 = arith.constant 0 : i32
    return %arg0, %arg1 : i32, i32
  }
  func.func @transform_1(%arg0: i32, %arg1: i32) -> (i32, i32) {
    %c0_i32 = arith.constant 0 : i32
    %c0_i32_0 = arith.constant 0 : i32
    return %arg1, %c0_i32 : i32, i32
  }
  func.func @transform_2(%arg0: i32, %arg1: i32) -> (i32, i32) {
    %c0_i32 = arith.constant 0 : i32
    %c0_i32_0 = arith.constant 0 : i32
    %c0_i32_1 = arith.constant 0 : i32
    return %c0_i32, %c0_i32_0 : i32, i32
  }
  func.func @transform_3(%arg0: i32, %arg1: i32) -> (i32, i32) {
    %c0_i32 = arith.constant 0 : i32
    %c0_i32_0 = arith.constant 0 : i32
    %c0_i32_1 = arith.constant 0 : i32
    return %c0_i32, %c0_i32_0 : i32, i32
  }
  func.func @transform_4(%arg0: i32, %arg1: i32) -> (i32, i32) {
    %c0_i32 = arith.constant 0 : i32
    %c0_i32_0 = arith.constant 0 : i32
    %c0_i32_1 = arith.constant 0 : i32
    return %c0_i32, %c0_i32_0 : i32, i32
  }
  func.func @transform_5(%arg0: i32, %arg1: i32) -> (i32, i32) {
    %c0_i32 = arith.constant 0 : i32
    %c0_i32_0 = arith.constant 0 : i32
    %c0_i32_1 = arith.constant 0 : i32
    return %c0_i32, %c0_i32_0 : i32, i32
  }
  func.func @transform_6(%arg0: i32, %arg1: i32) -> (i32, i32) {
    %c0_i32 = arith.constant 0 : i32
    %c0_i32_0 = arith.constant 0 : i32
    return %arg0, %c0_i32 : i32, i32
  }
}

</mosaic_0001>

<bundles_post_ra>
// kernel: gcn_forward.2
= control target key start
LH: loop header
LB: loop body
LE: loop exit
PB: predicated region body
PF: predicated region fallthrough
CT: control target
= control target key end

     0   :  { %s1242_s15 = smov 0   ;;  %s1244_s16 = smov 0   ;;  %s1411_s0 = inlined_call_operand.vmem [shape: bf16[256,256], index: 0, kind: input, shape index: {}]   ;;  %s1412_s1 = inlined_call_operand.vmem [shape: bf16[256,128], index: 1, kind: input, shape index: {}]   ;;  %s1413_s2 = inlined_call_operand.vmem [shape: bf16[128,128], index: 2, kind: input, shape index: {}]   ;;  %s1414_s3 = inlined_call_operand.vmem [shape: f32[1,128], index: 3, kind: input, shape index: {}]   ;;  %s1415_s4 = inlined_call_operand.vmem [shape: bf16[256,128], index: 4, kind: output, shape index: {}]  }
   0x1   :  { %s1246_s17 = smov 0   ;;  %s1248_s18 = smov 0  }
   0x2   :  { %s1250_s19 = smov 0   ;;  %s1252_s20 = smov 0  }
   0x3   :  { %s1254_s21 = smov 0  }
   0x4 LB: > { %s23_s22 = sadd.s32 1, %s1206_s19  ;;  %s26_s23 = sadd.s32 1, %s1210_s20  ;;  %s1214_s21 = sphi %s1254_s21, %s14_s21   ;;  %s1210_s20 = sphi %s1252_s20, %s1421_s20   ;;  %s1206_s19 = sphi %s1250_s19, %s1420_s19   ;;  %s1202_s18 = sphi %s1248_s18, %s1419_s18   ;;  %s1198_s17 = sphi %s1246_s17, %s1418_s17   ;;  %s1194_s16 = sphi %s1244_s16, %s1417_s16   ;;  %s1190_s15 = sphi %s1242_s15, %s1416_s15  }
   0x5   : > { %p24_p0 = scmp.ge.s32.totalorder %s23_s22, 2  ;;  %p42_p1 = scmp.ne.s32.totalorder %s1194_s16, %s1190_s15 }
   0x6   : > { %p43_p2 = scmp.eq.s32.totalorder %s1214_s21, 0  ;;  %s35_s27 = sadd.s32 1, %s1194_s16 }
   0x7   : > { %s1423_s22 = smov (%p24_p0, %s23_s22), 0  ;;  %s1425_s23 = smov (!%p24_p0, %s26_s23), %s1210_s20 }
   0x8   : > { %p44_p3 = por %p43_p2, %p42_p1  ;;  %p28_p4 = scmp.ge.s32.totalorder %s1425_s23, 2 }
   0x9   : > { %s31_s24 = ssub.s32 %s1206_s19, %s1423_s22  ;;  %p871_p6 = scmp.ge.s32.totalorder %s1214_s21, 4 }
   0xa   : > { %s1427_s23 = smov (%p28_p4, %s1425_s23), 0 }
   0xb   : > { %s30_s25 = ssub.s32 %s1210_s20, %s1427_s23  ;;  %168 = sbr.rel (%p871_p6) target bundleno = 38 (0x26), region = 24 }
   0xc   : > { %s32_s26 = sor.u32 %s31_s24, %s30_s25 }
   0xd   : > { %p33_p5 = scmp.eq.s32.totalorder %s32_s26, 0 }
   0xf   : > { %s1293_s28 = scalar_select %p33_p5, %s1194_s16, %s35_s27  }
  0x10   : > { %171 = sbr.rel (!%p44_p3) target bundleno = 38 (0x26), region = 28  ;;  %s173_s29 = sand.u32 (%p44_p3), 1, %s1194_s16  }
  0x11   : > { %s982_s30 = sshll.u32 (%p44_p3), %s1210_s20, 5  ;;  %s872_s5 = sshll.u32 (%p44_p3), %s173_s29, 6 }
  0x12   : > { %s178_s6 = sadd.s32 (%p44_p3), %s1206_s19, %s982_s30  ;;  %s175_s11 = scalar_lea.vmem (%p44_p3), [#allocation3], %s872_s5 }
  0x13   : > { %s875_s7 = sshll.u32 (%p44_p3), %s178_s6, 2 }
  0x14   : > { %s1302_s10 = scalar_lea.vmem (%p44_p3), %s1411_s0, %s875_s7 }
  0x15   : > { %v197_v0 = vld [vmem:[%s1302_s10] sm:$0xf]  ;;  %v199_v1 = vld [vmem:[%s1302_s10 + $0x8] sm:$0xf]  ;;  %v201_v2 = vld [vmem:[%s1302_s10 + $0x10] sm:$0xf] }
  0x16   : > { %198 = vst [vmem:[%s175_s11] sm:$0xf] %v197_v0  ;;  %v203_v3 = vld [vmem:[%s1302_s10 + $0x18] sm:$0xf]  ;;  %v205_v4 = vld [vmem:[%s1302_s10 + $0x20] sm:$0xf] }
  0x17   : > { %200 = vst [vmem:[%s175_s11 + $0x4] sm:$0xf] %v199_v1  ;;  %v207_v5 = vld [vmem:[%s1302_s10 + $0x28] sm:$0xf]  ;;  %v209_v6 = vld [vmem:[%s1302_s10 + $0x30] sm:$0xf] }
  0x18   : > { %202 = vst [vmem:[%s175_s11 + $0x8] sm:$0xf] %v201_v2  ;;  %v211_v7 = vld [vmem:[%s1302_s10 + $0x38] sm:$0xf]  ;;  %v213_v8 = vld [vmem:[%s1302_s10 + $0x40] sm:$0xf] }
  0x19   : > { %204 = vst [vmem:[%s175_s11 + $0xc] sm:$0xf] %v203_v3  ;;  %v215_v9 = vld [vmem:[%s1302_s10 + $0x48] sm:$0xf]  ;;  %v217_v10 = vld [vmem:[%s1302_s10 + $0x50] sm:$0xf] }
  0x1a   : > { %206 = vst [vmem:[%s175_s11 + $0x10] sm:$0xf] %v205_v4  ;;  %v219_v11 = vld [vmem:[%s1302_s10 + $0x58] sm:$0xf]  ;;  %v221_v12 = vld [vmem:[%s1302_s10 + $0x60] sm:$0xf] }
  0x1b   : > { %208 = vst [vmem:[%s175_s11 + $0x14] sm:$0xf] %v207_v5  ;;  %v223_v13 = vld [vmem:[%s1302_s10 + $0x68] sm:$0xf]  ;;  %v225_v14 = vld [vmem:[%s1302_s10 + $0x70] sm:$0xf] }
  0x1c   : > { %210 = vst [vmem:[%s175_s11 + $0x18] sm:$0xf] %v209_v6  ;;  %v227_v15 = vld [vmem:[%s1302_s10 + $0x78] sm:$0xf] }
  0x1d   : > { %212 = vst [vmem:[%s175_s11 + $0x1c] sm:$0xf] %v211_v7 }
  0x1e   : > { %214 = vst [vmem:[%s175_s11 + $0x20] sm:$0xf] %v213_v8 }
  0x1f   : > { %216 = vst [vmem:[%s175_s11 + $0x24] sm:$0xf] %v215_v9 }
  0x20   : > { %218 = vst [vmem:[%s175_s11 + $0x28] sm:$0xf] %v217_v10 }
  0x21   : > { %220 = vst [vmem:[%s175_s11 + $0x2c] sm:$0xf] %v219_v11 }
  0x22   : > { %222 = vst [vmem:[%s175_s11 + $0x30] sm:$0xf] %v221_v12 }
  0x23   : > { %224 = vst [vmem:[%s175_s11 + $0x34] sm:$0xf] %v223_v13 }
  0x24   : > { %226 = vst [vmem:[%s175_s11 + $0x38] sm:$0xf] %v225_v14 }
  0x25   : > { %228 = vst [vmem:[%s175_s11 + $0x3c] sm:$0xf] %v227_v15 }
  0x26 PF: > { %p876_p7 = scmp.ge.s32.totalorder %s1214_s21, 1  ;;  %p292_p8 = scmp.lt.s32.totalorder %s1214_s21, 5 }
  0x28   : > { %p293_p9 = pnand %p876_p7, %p292_p8 }
  0x29   : > { %s299_s12 = sand.u32 (!%p293_p9), 1, %s1190_s15   ;;  %s878_s13 = sshll.u32 (!%p293_p9), %s1198_s17, 4 }
  0x2a   : > { %296 = sbr.rel (%p293_p9) target bundleno = 462 (0x1ce), region = 73  ;;  %s877_s14 = sshll.u32 (!%p293_p9), %s299_s12, 6 }
  0x2b   : > { %p331_p10 = scmp.lt.s32.totalorder (!%p293_p9), %s878_s13, 31  ;;  %s880_s24 = sshll.u32 (!%p293_p9), %s1202_s18, 4 }
  0x2c   : > { %p337_p11 = scmp.lt.s32.totalorder (!%p293_p9), %s880_s24, 31  ;;  %s1335_s15 = scalar_lea.vmem (!%p293_p9), [#allocation3], %s877_s14 }
  0x2d   : > { %p882_p12 = scmp.ne.s32.totalorder (!%p293_p9), %s1198_s17, 0 }
  0x2f   : > { %s1429_s13 = smov (!%p331_p10, %s878_s13), 31  ;;  %s1431_s24 = smov (!%p337_p11, %s880_s24), 31 }
  0x30   : > { %s879_s25 = sshll.u32 %s1429_s13, 2  ;;  %s881_s30 = sshll.u32 %s1431_s24, 2 }
  0x31   : > { %s1328_s29 = scalar_lea.vmem %s1412_s1, %s879_s25  ;;  %s1333_s7 = scalar_lea.vmem %s1415_s4, %s881_s30 }
  0x32   : > { %345 = sbr.rel (%p882_p12) target bundleno = 72 (0x48), region = 81 }
  0x37   : > { %v1216_v16 = vmov 0.0  }
  0x38   : > { %346 = vst [vmem:[#allocation2 + $0x30] sm:$0xff] %v1216_v16 }
  0x39   : > { %347 = vst [vmem:[#allocation2] sm:$0xff] %v1216_v16 }
  0x3a   : > { %348 = vst [vmem:[#allocation2 + $0x58] sm:$0xff] %v1216_v16 }
  0x3b   : > { %349 = vst [vmem:[#allocation2 + $0x18] sm:$0xff] %v1216_v16 }
  0x3c   : > { %350 = vst [vmem:[#allocation2 + $0x50] sm:$0xff] %v1216_v16 }
  0x3d   : > { %351 = vst [vmem:[#allocation2 + $0x68] sm:$0xff] %v1216_v16 }
  0x3e   : > { %352 = vst [vmem:[#allocation2 + $0x8] sm:$0xff] %v1216_v16 }
  0x3f   : > { %353 = vst [vmem:[#allocation2 + $0x48] sm:$0xff] %v1216_v16 }
  0x40   : > { %354 = vst [vmem:[#allocation2 + $0x40] sm:$0xff] %v1216_v16 }
  0x41   : > { %355 = vst [vmem:[#allocation2 + $0x20] sm:$0xff] %v1216_v16 }
  0x42   : > { %356 = vst [vmem:[#allocation2 + $0x10] sm:$0xff] %v1216_v16 }
  0x43   : > { %357 = vst [vmem:[#allocation2 + $0x38] sm:$0xff] %v1216_v16 }
  0x44   : > { %358 = vst [vmem:[#allocation2 + $0x60] sm:$0xff] %v1216_v16 }
  0x45   : > { %359 = vst [vmem:[#allocation2 + $0x70] sm:$0xff] %v1216_v16 }
  0x46   : > { %360 = vst [vmem:[#allocation2 + $0x78] sm:$0xff] %v1216_v16 }
  0x47   : > { %361 = vst [vmem:[#allocation2 + $0x28] sm:$0xff] %v1216_v16 }
  0x48 PF: > { %v998_v17 = vld [vmem:[%s1328_s29 + $0x38] sm:$0xff]  ;;  %v997_v18 = vld [vmem:[%s1328_s29 + $0x30] sm:$0xff]  ;;  %v996_v19 = vld [vmem:[%s1328_s29 + $0x28] sm:$0xff]  ;;  %p947_p13 = scmp.ne.s32.totalorder %s1198_s17, 1 }
  0x49   : > { %506 = vmatpush.bf16.msra.mxu0 %v998_v17  ;;  %1054 = vmatpush.bf16.msra.mxu1 %v998_v17  ;;  %v995_v20 = vld [vmem:[%s1328_s29 + $0x20] sm:$0xff]  ;;  %v994_v21 = vld [vmem:[%s1328_s29 + $0x18] sm:$0xff]  ;;  %v993_v22 = vld [vmem:[%s1328_s29 + $0x10] sm:$0xff] }
  0x4a   : > { %1055 = vmatpush.bf16.msra.mxu2 %v998_v17  ;;  %1056 = vmatpush.bf16.msra.mxu3 %v998_v17  ;;  %v992_v23 = vld [vmem:[%s1328_s29 + $0x8] sm:$0xff]  ;;  %v991_v24 = vld [vmem:[%s1328_s29] sm:$0xff]  ;;  %v985_v26 = vld [vmem:[%s1335_s15 + $0x10] sm:$0xff] }
  0x4b   : > { %v983_v25 = vld [vmem:[%s1335_s15] sm:$0xff]  ;;  %v989_v28 = vld [vmem:[%s1335_s15 + $0x30] sm:$0xff]  ;;  %v984_v29 = vld [vmem:[%s1335_s15 + $0x8] sm:$0xff] }
  0x4c   : > { %v987_v27 = vld [vmem:[%s1335_s15 + $0x20] sm:$0xff]  ;;  %v986_v30 = vld [vmem:[%s1335_s15 + $0x18] sm:$0xff]  ;;  %v988_v31 = vld [vmem:[%s1335_s15 + $0x28] sm:$0xff] }
  0x4d   : > { %507 = vmatpush.bf16.msra.mxu0 %v997_v18  ;;  %1057 = vmatpush.bf16.msra.mxu1 %v997_v18  ;;  %v990_v32 = vld [vmem:[%s1335_s15 + $0x38] sm:$0xff]  ;;  %v362_v33 = vld [vmem:[#allocation2 + $0x30] sm:$0xff]  ;;  %v370_v39 = vld [vmem:[#allocation2 + $0x40] sm:$0xff] }
  0x4e   : > { %1058 = vmatpush.bf16.msra.mxu2 %v997_v18  ;;  %1059 = vmatpush.bf16.msra.mxu3 %v997_v18  ;;  %v366_v34 = vld [vmem:[#allocation2 + $0x50] sm:$0xff]  ;;  %v374_v40 = vld [vmem:[#allocation2 + $0x60] sm:$0xff]  ;;  %v367_v42 = vld [vmem:[#allocation2 + $0x68] sm:$0xff] }
  0x4f   : > { %v363_v41 = vld [vmem:[#allocation2] sm:$0xff]  ;;  %v375_v52 = vld [vmem:[#allocation2 + $0x70] sm:$0xff]  ;;  %v364_v53 = vld [vmem:[#allocation2 + $0x58] sm:$0xff] }
  0x50   : > { %v371_v51 = vld [vmem:[#allocation2 + $0x20] sm:$0xff]  ;;  %v368_v54 = vld [vmem:[#allocation2 + $0x8] sm:$0xff]  ;;  %v372_v63 = vld [vmem:[#allocation2 + $0x10] sm:$0xff] }
  0x51   : > { %508 = vmatpush.bf16.msra.mxu0 %v996_v19  ;;  %1060 = vmatpush.bf16.msra.mxu1 %v996_v19  ;;  %v376_v0 = vld [vmem:[#allocation2 + $0x78] sm:$0xff]  ;;  %v369_v2 = vld [vmem:[#allocation2 + $0x48] sm:$0xff] }
  0x52   : > { %1061 = vmatpush.bf16.msra.mxu2 %v996_v19  ;;  %1062 = vmatpush.bf16.msra.mxu3 %v996_v19  ;;  %v365_v1 = vld [vmem:[#allocation2 + $0x18] sm:$0xff]  ;;  %v377_v12 = vld [vmem:[#allocation2 + $0x28] sm:$0xff] }
  0x53   : > { %v373_v11 = vld [vmem:[#allocation2 + $0x38] sm:$0xff] }
  0x55   : > { %509 = vmatpush.bf16.msra.mxu0 %v995_v20  ;;  %1063 = vmatpush.bf16.msra.mxu1 %v995_v20 }
  0x56   : > { %1064 = vmatpush.bf16.msra.mxu2 %v995_v20  ;;  %1065 = vmatpush.bf16.msra.mxu3 %v995_v20 }
  0x59   : > { %510 = vmatpush.bf16.msra.mxu0 %v994_v21  ;;  %1066 = vmatpush.bf16.msra.mxu1 %v994_v21 }
  0x5a   : > { %1067 = vmatpush.bf16.msra.mxu2 %v994_v21  ;;  %1068 = vmatpush.bf16.msra.mxu3 %v994_v21 }
  0x5d   : > { %511 = vmatpush.bf16.msra.mxu0 %v993_v22  ;;  %1069 = vmatpush.bf16.msra.mxu1 %v993_v22 }
  0x5e   : > { %1070 = vmatpush.bf16.msra.mxu2 %v993_v22  ;;  %1071 = vmatpush.bf16.msra.mxu3 %v993_v22 }
  0x61   : > { %512 = vmatpush.bf16.msra.mxu0 %v992_v23  ;;  %1072 = vmatpush.bf16.msra.mxu1 %v992_v23 }
  0x62   : > { %1073 = vmatpush.bf16.msra.mxu2 %v992_v23  ;;  %1074 = vmatpush.bf16.msra.mxu3 %v992_v23 }
  0x65   : > { %513 = vmatpush.bf16.msra.mxu0 %v991_v24  ;;  %1075 = vmatpush.bf16.msra.mxu1 %v991_v24 }
  0x66   : > { %1076 = vmatpush.bf16.msra.mxu2 %v991_v24  ;;  %1077 = vmatpush.bf16.msra.mxu3 %v991_v24 }
  0x68   : > { %514 = vmatmul.bf16.vlgmr.msra.gmra.mxu0 %v983_v25  ;;  %524 = vmatmul.bf16.vlgmr.msra.gmra.mxu1 %v985_v26 }
  0x69   : > { %534 = vmatmul.bf16.vlgmr.msra.gmra.mxu2 %v987_v27  ;;  %544 = vmatmul.bf16.vlgmr.msra.gmra.mxu3 %v989_v28 }
  0x78   : > { %519 = vmatmul.bf16.gmra.mxu0 %v984_v29  ;;  %529 = vmatmul.bf16.gmra.mxu1 %v986_v30 }
  0x79   : > { %539 = vmatmul.bf16.gmra.mxu2 %v988_v31  ;;  %549 = vmatmul.bf16.gmra.mxu3 %v990_v32 }
  0xe5   : > { %v515_v35 = vpop.f32.mrf.mxu0  ;;  %v525_v36 = vpop.f32.mrf.mxu1 }
  0xe6   : > { %v555_v37 = vadd.f32 %v515_v35, %v362_v33  ;;  %v559_v38 = vadd.f32 %v525_v36, %v366_v34 }
  0xe8   : > { %571 = vst [vmem:[#allocation2 + $0x30] sm:$0xff] %v555_v37 }
  0xe9   : > { %575 = vst [vmem:[#allocation2 + $0x50] sm:$0xff] %v559_v38 }
  0xec   : > { %v535_v43 = vpop.f32.mrf.mxu2  ;;  %v545_v44 = vpop.f32.mrf.mxu3 }
  0xed   : > { %v563_v45 = vadd.f32 %v535_v43, %v370_v39  ;;  %v567_v46 = vadd.f32 %v545_v44, %v374_v40  ;;  %v517_v47 = vpop.f32.mrf.mxu0  ;;  %v527_v48 = vpop.f32.mrf.mxu1 }
  0xee   : > { %v556_v49 = vadd.f32 %v517_v47, %v363_v41  ;;  %v560_v50 = vadd.f32 %v527_v48, %v367_v42 }
  0xef   : > { %579 = vst [vmem:[#allocation2 + $0x40] sm:$0xff] %v563_v45 }
  0xf0   : > { %583 = vst [vmem:[#allocation2 + $0x60] sm:$0xff] %v567_v46 }
  0xf1   : > { %572 = vst [vmem:[#allocation2] sm:$0xff] %v556_v49 }
  0xf2   : > { %576 = vst [vmem:[#allocation2 + $0x68] sm:$0xff] %v560_v50 }
  0xf4   : > { %v537_v55 = vpop.f32.mrf.mxu2  ;;  %v547_v56 = vpop.f32.mrf.mxu3 }
  0xf5   : > { %v564_v57 = vadd.f32 %v537_v55, %v371_v51  ;;  %v568_v58 = vadd.f32 %v547_v56, %v375_v52  ;;  %v520_v59 = vpop.f32.mrf.mxu0  ;;  %v530_v60 = vpop.f32.mrf.mxu1 }
  0xf6   : > { %v557_v61 = vadd.f32 %v520_v59, %v364_v53  ;;  %v561_v62 = vadd.f32 %v530_v60, %v368_v54 }
  0xf7   : > { %580 = vst [vmem:[#allocation2 + $0x20] sm:$0xff] %v564_v57 }
  0xf8   : > { %584 = vst [vmem:[#allocation2 + $0x70] sm:$0xff] %v568_v58 }
  0xf9   : > { %573 = vst [vmem:[#allocation2 + $0x58] sm:$0xff] %v557_v61 }
  0xfa   : > { %577 = vst [vmem:[#allocation2 + $0x8] sm:$0xff] %v561_v62 }
  0xfc   : > { %v540_v3 = vpop.f32.mrf.mxu2  ;;  %v550_v4 = vpop.f32.mrf.mxu3 }
  0xfd   : > { %v565_v5 = vadd.f32 %v540_v3, %v372_v63  ;;  %v569_v6 = vadd.f32 %v550_v4, %v376_v0  ;;  %v522_v7 = vpop.f32.mrf.mxu0  ;;  %v532_v8 = vpop.f32.mrf.mxu1 }
  0xfe   : > { %v558_v9 = vadd.f32 %v522_v7, %v365_v1  ;;  %v562_v10 = vadd.f32 %v532_v8, %v369_v2 }
  0xff   : > { %581 = vst [vmem:[#allocation2 + $0x10] sm:$0xff] %v565_v5 }
 0x100   : > { %585 = vst [vmem:[#allocation2 + $0x78] sm:$0xff] %v569_v6 }
 0x101   : > { %574 = vst [vmem:[#allocation2 + $0x18] sm:$0xff] %v558_v9 }
 0x102   : > { %578 = vst [vmem:[#allocation2 + $0x48] sm:$0xff] %v562_v10 }
 0x104   : > { %v542_v13 = vpop.f32.mrf.mxu2  ;;  %v552_v14 = vpop.f32.mrf.mxu3  ;;  %590 = sbr.rel (%p947_p13) target bundleno = 462 (0x1ce), region = 85 }
 0x105   : > { %v566_v15 = vadd.f32 %v542_v13, %v373_v11  ;;  %v570_v16 = vadd.f32 %v552_v14, %v377_v12 }
 0x107   : > { %582 = vst [vmem:[#allocation2 + $0x38] sm:$0xff] %v566_v15 }
 0x108   : > { %586 = vst [vmem:[#allocation2 + $0x28] sm:$0xff] %v570_v16 }
 0x109   : > { %v1006_v17 = vld [vmem:[%s1413_s2 + $0x38] sm:$0xff]  ;;  %v1005_v18 = vld [vmem:[%s1413_s2 + $0x30] sm:$0xff]  ;;  %v1004_v19 = vld [vmem:[%s1413_s2 + $0x28] sm:$0xff] }
 0x10a   : > { %683 = vmatpush.bf16.msra.mxu0 %v1006_v17  ;;  %1078 = vmatpush.bf16.msra.mxu1 %v1006_v17  ;;  %v1003_v20 = vld [vmem:[%s1413_s2 + $0x20] sm:$0xff]  ;;  %v1002_v21 = vld [vmem:[%s1413_s2 + $0x18] sm:$0xff]  ;;  %v1001_v22 = vld [vmem:[%s1413_s2 + $0x10] sm:$0xff] }
 0x10b   : > { %1079 = vmatpush.bf16.msra.mxu2 %v1006_v17  ;;  %1080 = vmatpush.bf16.msra.mxu3 %v1006_v17  ;;  %v1000_v23 = vld [vmem:[%s1413_s2 + $0x8] sm:$0xff]  ;;  %v999_v24 = vld [vmem:[%s1413_s2] sm:$0xff]  ;;  %v591_v25 = vld [vmem:[#allocation2 + $0x30] sm:$0xff] }
 0x10c   : > { %v592_v26 = vld [vmem:[#allocation2] sm:$0xff]  ;;  %v595_v27 = vld [vmem:[#allocation2 + $0x50] sm:$0xff]  ;;  %v596_v28 = vld [vmem:[#allocation2 + $0x68] sm:$0xff] }
 0x10d   : > { %v599_v29 = vld [vmem:[#allocation2 + $0x40] sm:$0xff]  ;;  %v604_v32 = vld [vmem:[#allocation2 + $0x70] sm:$0xff]  ;;  %v607_v33 = vpack.c.bf16 %v592_v26, %v591_v25  ;;  %v609_v34 = vpack.c.bf16 %v596_v28, %v595_v27  ;;  %v593_v37 = vld [vmem:[#allocation2 + $0x58] sm:$0xff] }
 0x10e   : > { %684 = vmatpush.bf16.msra.mxu0 %v1005_v18  ;;  %1081 = vmatpush.bf16.msra.mxu1 %v1005_v18  ;;  %v600_v30 = vld [vmem:[#allocation2 + $0x20] sm:$0xff]  ;;  %v594_v38 = vld [vmem:[#allocation2 + $0x18] sm:$0xff]  ;;  %v597_v39 = vld [vmem:[#allocation2 + $0x8] sm:$0xff] }
 0x10f   : > { %1082 = vmatpush.bf16.msra.mxu2 %v1005_v18  ;;  %1083 = vmatpush.bf16.msra.mxu3 %v1005_v18  ;;  %v603_v31 = vld [vmem:[#allocation2 + $0x60] sm:$0xff]  ;;  %v611_v35 = vpack.c.bf16 %v600_v30, %v599_v29  ;;  %v598_v40 = vld [vmem:[#allocation2 + $0x48] sm:$0xff]  ;;  %v601_v41 = vld [vmem:[#allocation2 + $0x10] sm:$0xff]  ;;  %v608_v45 = vpack.c.bf16 %v594_v38, %v593_v37 }
 0x110   : > { %v613_v36 = vpack.c.bf16 %v604_v32, %v603_v31  ;;  %v602_v42 = vld [vmem:[#allocation2 + $0x38] sm:$0xff]  ;;  %v606_v44 = vld [vmem:[#allocation2 + $0x28] sm:$0xff]  ;;  %v610_v46 = vpack.c.bf16 %v598_v40, %v597_v39  ;;  %v1159_v51 = vld [vmem:[%s1414_s3] ss:$0 sm:$0xff] }
 0x111   : > { %v605_v43 = vld [vmem:[#allocation2 + $0x78] sm:$0xff]  ;;  %v612_v47 = vpack.c.bf16 %v602_v42, %v601_v41 }
 0x112   : > { %685 = vmatpush.bf16.msra.mxu0 %v1004_v19  ;;  %1084 = vmatpush.bf16.msra.mxu1 %v1004_v19  ;;  %v614_v48 = vpack.c.bf16 %v606_v44, %v605_v43 }
 0x113   : > { %1085 = vmatpush.bf16.msra.mxu2 %v1004_v19  ;;  %1086 = vmatpush.bf16.msra.mxu3 %v1004_v19 }
 0x116   : > { %686 = vmatpush.bf16.msra.mxu0 %v1003_v20  ;;  %1087 = vmatpush.bf16.msra.mxu1 %v1003_v20 }
 0x117   : > { %1088 = vmatpush.bf16.msra.mxu2 %v1003_v20  ;;  %1089 = vmatpush.bf16.msra.mxu3 %v1003_v20 }
 0x11a   : > { %687 = vmatpush.bf16.msra.mxu0 %v1002_v21  ;;  %1090 = vmatpush.bf16.msra.mxu1 %v1002_v21 }
 0x11b   : > { %1091 = vmatpush.bf16.msra.mxu2 %v1002_v21  ;;  %1092 = vmatpush.bf16.msra.mxu3 %v1002_v21 }
 0x11e   : > { %688 = vmatpush.bf16.msra.mxu0 %v1001_v22  ;;  %1093 = vmatpush.bf16.msra.mxu1 %v1001_v22 }
 0x11f   : > { %1094 = vmatpush.bf16.msra.mxu2 %v1001_v22  ;;  %1095 = vmatpush.bf16.msra.mxu3 %v1001_v22 }
 0x122   : > { %689 = vmatpush.bf16.msra.mxu0 %v1000_v23  ;;  %1096 = vmatpush.bf16.msra.mxu1 %v1000_v23 }
 0x123   : > { %1097 = vmatpush.bf16.msra.mxu2 %v1000_v23  ;;  %1098 = vmatpush.bf16.msra.mxu3 %v1000_v23 }
 0x126   : > { %690 = vmatpush.bf16.msra.mxu0 %v999_v24  ;;  %1099 = vmatpush.bf16.msra.mxu1 %v999_v24 }
 0x127   : > { %1100 = vmatpush.bf16.msra.mxu2 %v999_v24  ;;  %1101 = vmatpush.bf16.msra.mxu3 %v999_v24 }
 0x129   : > { %691 = vmatmul.bf16.vlgmr.msra.gmra.mxu0 %v607_v33  ;;  %701 = vmatmul.bf16.vlgmr.msra.gmra.mxu1 %v609_v34 }
 0x12a   : > { %711 = vmatmul.bf16.vlgmr.msra.gmra.mxu2 %v611_v35  ;;  %721 = vmatmul.bf16.vlgmr.msra.gmra.mxu3 %v613_v36 }
 0x139   : > { %696 = vmatmul.bf16.gmra.mxu0 %v608_v45  ;;  %706 = vmatmul.bf16.gmra.mxu1 %v610_v46 }
 0x13a   : > { %716 = vmatmul.bf16.gmra.mxu2 %v612_v47  ;;  %726 = vmatmul.bf16.gmra.mxu3 %v614_v48 }
 0x1a6   : > { %v692_v49 = vpop.f32.mrf.mxu0  ;;  %v702_v50 = vpop.f32.mrf.mxu1 }
 0x1a7   : > { %v693_v52 = vadd.f32 %v1159_v51, %v692_v49  ;;  %v703_v53 = vadd.f32 %v1159_v51, %v702_v50 }
 0x1a9   : > { %v732_v60 = vmax.f32 %v693_v52, 0.0  ;;  %v736_v61 = vmax.f32 %v703_v53, 0.0 }
 0x1ad   : > { %v712_v54 = vpop.f32.mrf.mxu2  ;;  %v722_v55 = vpop.f32.mrf.mxu3 }
 0x1ae   : > { %v694_v56 = vpop.f32.mrf.mxu0  ;;  %v704_v57 = vpop.f32.mrf.mxu1  ;;  %v713_v2 = vadd.f32 %v1159_v51, %v712_v54  ;;  %v723_v3 = vadd.f32 %v1159_v51, %v722_v55 }
 0x1af   : > { %v695_v58 = vadd.f32 %v1159_v51, %v694_v56  ;;  %v705_v59 = vadd.f32 %v1159_v51, %v704_v57 }
 0x1b0   : > { %v740_v10 = vmax.f32 %v713_v2, 0.0  ;;  %v744_v11 = vmax.f32 %v723_v3, 0.0 }
 0x1b1   : > { %v733_v62 = vmax.f32 %v695_v58, 0.0  ;;  %v737_v63 = vmax.f32 %v705_v59, 0.0 }
 0x1b3   : > { %v1010_v0 = vpack.c.bf16 %v733_v62, %v732_v60  ;;  %v1020_v1 = vpack.c.bf16 %v737_v63, %v736_v61 }
 0x1b5   : > { %1011 = vst [vmem:[%s1333_s7] sm:$0xff] %v1010_v0   ;;  %v714_v4 = vpop.f32.mrf.mxu2  ;;  %v724_v5 = vpop.f32.mrf.mxu3 }
 0x1b6   : > { %1048 = vst [vmem:[%s1333_s7 + $0x10] sm:$0xff] %v1020_v1   ;;  %v715_v6 = vadd.f32 %v1159_v51, %v714_v4  ;;  %v725_v7 = vadd.f32 %v1159_v51, %v724_v5  ;;  %v697_v8 = vpop.f32.mrf.mxu0  ;;  %v707_v9 = vpop.f32.mrf.mxu1 }
 0x1b7   : > { %v698_v16 = vadd.f32 %v1159_v51, %v697_v8  ;;  %v708_v17 = vadd.f32 %v1159_v51, %v707_v9 }
 0x1b8   : > { %v741_v12 = vmax.f32 %v715_v6, 0.0  ;;  %v745_v13 = vmax.f32 %v725_v7, 0.0 }
 0x1b9   : > { %v734_v24 = vmax.f32 %v698_v16, 0.0  ;;  %v738_v25 = vmax.f32 %v708_v17, 0.0 }
 0x1ba   : > { %v1030_v14 = vpack.c.bf16 %v741_v12, %v740_v10  ;;  %v1040_v15 = vpack.c.bf16 %v745_v13, %v744_v11 }
 0x1bc   : > { %1050 = vst [vmem:[%s1333_s7 + $0x20] sm:$0xff] %v1030_v14  }
 0x1bd   : > { %1052 = vst [vmem:[%s1333_s7 + $0x30] sm:$0xff] %v1040_v15   ;;  %v717_v18 = vpop.f32.mrf.mxu2  ;;  %v727_v19 = vpop.f32.mrf.mxu3 }
 0x1be   : > { %v699_v20 = vpop.f32.mrf.mxu0  ;;  %v709_v21 = vpop.f32.mrf.mxu1  ;;  %v718_v30 = vadd.f32 %v1159_v51, %v717_v18  ;;  %v728_v31 = vadd.f32 %v1159_v51, %v727_v19 }
 0x1bf   : > { %v700_v22 = vadd.f32 %v1159_v51, %v699_v20  ;;  %v710_v23 = vadd.f32 %v1159_v51, %v709_v21 }
 0x1c0   : > { %v742_v36 = vmax.f32 %v718_v30, 0.0  ;;  %v746_v37 = vmax.f32 %v728_v31, 0.0 }
 0x1c1   : > { %v735_v26 = vmax.f32 %v700_v22, 0.0  ;;  %v739_v27 = vmax.f32 %v710_v23, 0.0 }
 0x1c3   : > { %v1015_v28 = vpack.c.bf16 %v735_v26, %v734_v24  ;;  %v1025_v29 = vpack.c.bf16 %v739_v27, %v738_v25 }
 0x1c5   : > { %1047 = vst [vmem:[%s1333_s7 + $0x8] sm:$0xff] %v1015_v28   ;;  %v719_v32 = vpop.f32.mrf.mxu2  ;;  %v729_v33 = vpop.f32.mrf.mxu3 }
 0x1c6   : > { %1049 = vst [vmem:[%s1333_s7 + $0x18] sm:$0xff] %v1025_v29   ;;  %v720_v34 = vadd.f32 %v1159_v51, %v719_v32  ;;  %v730_v35 = vadd.f32 %v1159_v51, %v729_v33 }
 0x1c8   : > { %v743_v38 = vmax.f32 %v720_v34, 0.0  ;;  %v747_v39 = vmax.f32 %v730_v35, 0.0 }
 0x1ca   : > { %v1035_v40 = vpack.c.bf16 %v743_v38, %v742_v36  ;;  %v1045_v41 = vpack.c.bf16 %v747_v39, %v746_v37 }
 0x1cc   : > { %1051 = vst [vmem:[%s1333_s7 + $0x28] sm:$0xff] %v1035_v40  }
 0x1cd   : > { %1053 = vst [vmem:[%s1333_s7 + $0x38] sm:$0xff] %v1045_v41  }
 0x1ce PF: > { %s14_s21 = sadd.s32 1, %s1214_s21   ;;  %s1416_s15 = smov %s1194_s16 }
 0x1cf   : > { %p11_p0 = scmp.ge.s32.totalorder %s14_s21, 6   ;;  %s1417_s16 = smov %s1293_s28 }
 0x1d0   : > { %s1418_s17 = smov %s1206_s19  ;;  %s1419_s18 = smov %s1210_s20 }
 0x1d1   : > { %s1420_s19 = smov %s1423_s22  ;;  %s1421_s20 = smov %s1427_s23 }
 0x1d2   :  { %13 = sbr.rel (!%p11_p0) target bundleno = 4 (0x4), region = 123 }

// kernel: gcn_forward.3
= control target key start
LH: loop header
LB: loop body
LE: loop exit
PB: predicated region body
PF: predicated region fallthrough
CT: control target
= control target key end

     0   :  { %s1401_s21 = smov 0   ;;  %s1403_s22 = smov 0   ;;  %s1605_s0 = inlined_call_operand.vmem [shape: bf16[256,256], index: 0, kind: input, shape index: {}]   ;;  %s1606_s1 = inlined_call_operand.vmem [shape: bf16[256,128], index: 1, kind: input, shape index: {}]   ;;  %s1607_s2 = inlined_call_operand.vmem [shape: bf16[128,128], index: 2, kind: input, shape index: {}]   ;;  %s1608_s3 = inlined_call_operand.vmem [shape: f32[1,128], index: 3, kind: input, shape index: {}]   ;;  %s1609_s4 = inlined_call_operand.vmem [shape: bf16[128,128], index: 4, kind: input, shape index: {}]   ;;  %s1610_s5 = inlined_call_operand.vmem [shape: f32[1,128], index: 5, kind: input, shape index: {}]   ;;  %s1611_s6 = inlined_call_operand.vmem [shape: f32[256,128], index: 6, kind: output, shape index: {}]  }
   0x1   :  { %s1405_s23 = smov 0   ;;  %s1407_s24 = smov 0  }
   0x2   :  { %s1409_s25 = smov 0   ;;  %s1411_s26 = smov 0  }
   0x3   :  { %s1413_s27 = smov 0  }
   0x4 LB: > { %s25_s28 = sadd.s32 1, %s1355_s25  ;;  %s28_s29 = sadd.s32 1, %s1359_s26  ;;  %s1363_s27 = sphi %s1413_s27, %s16_s27   ;;  %s1359_s26 = sphi %s1411_s26, %s1617_s26   ;;  %s1355_s25 = sphi %s1409_s25, %s1616_s25   ;;  %s1351_s24 = sphi %s1407_s24, %s1615_s24   ;;  %s1347_s23 = sphi %s1405_s23, %s1614_s23   ;;  %s1343_s22 = sphi %s1403_s22, %s1613_s22   ;;  %s1339_s21 = sphi %s1401_s21, %s1612_s21  }
   0x5   : > { %p26_p0 = scmp.ge.s32.totalorder %s25_s28, 2  ;;  %p44_p1 = scmp.ne.s32.totalorder %s1343_s22, %s1339_s21 }
   0x6   : > { %p45_p2 = scmp.eq.s32.totalorder %s1363_s27, 0  ;;  %s37_s9 = sadd.s32 1, %s1343_s22 }
   0x7   : > { %s1619_s28 = smov (%p26_p0, %s25_s28), 0  ;;  %s1621_s29 = smov (!%p26_p0, %s28_s29), %s1359_s26 }
   0x8   : > { %p46_p3 = por %p45_p2, %p44_p1  ;;  %p30_p4 = scmp.ge.s32.totalorder %s1621_s29, 2 }
   0x9   : > { %s33_s30 = ssub.s32 %s1355_s25, %s1619_s28  ;;  %p1034_p6 = scmp.ge.s32.totalorder %s1363_s27, 4 }
   0xa   : > { %s1623_s29 = smov (%p30_p4, %s1621_s29), 0 }
   0xb   : > { %s32_s7 = ssub.s32 %s1359_s26, %s1623_s29  ;;  %218 = sbr.rel (%p1034_p6) target bundleno = 38 (0x26), region = 32 }
   0xc   : > { %s34_s8 = sor.u32 %s33_s30, %s32_s7 }
   0xd   : > { %p35_p5 = scmp.eq.s32.totalorder %s34_s8, 0 }
   0xf   : > { %s1452_s10 = scalar_select %p35_p5, %s1343_s22, %s37_s9  }
  0x10   : > { %221 = sbr.rel (!%p46_p3) target bundleno = 38 (0x26), region = 36  ;;  %s223_s11 = sand.u32 (%p46_p3), 1, %s1343_s22  }
  0x11   : > { %s1177_s12 = sshll.u32 (%p46_p3), %s1359_s26, 5  ;;  %s1035_s13 = sshll.u32 (%p46_p3), %s223_s11, 6 }
  0x12   : > { %s228_s14 = sadd.s32 (%p46_p3), %s1355_s25, %s1177_s12  ;;  %s225_s19 = scalar_lea.vmem (%p46_p3), [#allocation3], %s1035_s13 }
  0x13   : > { %s1038_s15 = sshll.u32 (%p46_p3), %s228_s14, 2 }
  0x14   : > { %s1461_s18 = scalar_lea.vmem (%p46_p3), %s1605_s0, %s1038_s15 }
  0x15   : > { %v247_v0 = vld [vmem:[%s1461_s18] sm:$0xf]  ;;  %v249_v1 = vld [vmem:[%s1461_s18 + $0x8] sm:$0xf]  ;;  %v251_v2 = vld [vmem:[%s1461_s18 + $0x10] sm:$0xf] }
  0x16   : > { %248 = vst [vmem:[%s225_s19] sm:$0xf] %v247_v0  ;;  %v253_v3 = vld [vmem:[%s1461_s18 + $0x18] sm:$0xf]  ;;  %v255_v4 = vld [vmem:[%s1461_s18 + $0x20] sm:$0xf] }
  0x17   : > { %250 = vst [vmem:[%s225_s19 + $0x4] sm:$0xf] %v249_v1  ;;  %v257_v5 = vld [vmem:[%s1461_s18 + $0x28] sm:$0xf]  ;;  %v259_v6 = vld [vmem:[%s1461_s18 + $0x30] sm:$0xf] }
  0x18   : > { %252 = vst [vmem:[%s225_s19 + $0x8] sm:$0xf] %v251_v2  ;;  %v261_v7 = vld [vmem:[%s1461_s18 + $0x38] sm:$0xf]  ;;  %v263_v8 = vld [vmem:[%s1461_s18 + $0x40] sm:$0xf] }
  0x19   : > { %254 = vst [vmem:[%s225_s19 + $0xc] sm:$0xf] %v253_v3  ;;  %v265_v9 = vld [vmem:[%s1461_s18 + $0x48] sm:$0xf]  ;;  %v267_v10 = vld [vmem:[%s1461_s18 + $0x50] sm:$0xf] }
  0x1a   : > { %256 = vst [vmem:[%s225_s19 + $0x10] sm:$0xf] %v255_v4  ;;  %v269_v11 = vld [vmem:[%s1461_s18 + $0x58] sm:$0xf]  ;;  %v271_v12 = vld [vmem:[%s1461_s18 + $0x60] sm:$0xf] }
  0x1b   : > { %258 = vst [vmem:[%s225_s19 + $0x14] sm:$0xf] %v257_v5  ;;  %v273_v13 = vld [vmem:[%s1461_s18 + $0x68] sm:$0xf]  ;;  %v275_v14 = vld [vmem:[%s1461_s18 + $0x70] sm:$0xf] }
  0x1c   : > { %260 = vst [vmem:[%s225_s19 + $0x18] sm:$0xf] %v259_v6  ;;  %v277_v15 = vld [vmem:[%s1461_s18 + $0x78] sm:$0xf] }
  0x1d   : > { %262 = vst [vmem:[%s225_s19 + $0x1c] sm:$0xf] %v261_v7 }
  0x1e   : > { %264 = vst [vmem:[%s225_s19 + $0x20] sm:$0xf] %v263_v8 }
  0x1f   : > { %266 = vst [vmem:[%s225_s19 + $0x24] sm:$0xf] %v265_v9 }
  0x20   : > { %268 = vst [vmem:[%s225_s19 + $0x28] sm:$0xf] %v267_v10 }
  0x21   : > { %270 = vst [vmem:[%s225_s19 + $0x2c] sm:$0xf] %v269_v11 }
  0x22   : > { %272 = vst [vmem:[%s225_s19 + $0x30] sm:$0xf] %v271_v12 }
  0x23   : > { %274 = vst [vmem:[%s225_s19 + $0x34] sm:$0xf] %v273_v13 }
  0x24   : > { %276 = vst [vmem:[%s225_s19 + $0x38] sm:$0xf] %v275_v14 }
  0x25   : > { %278 = vst [vmem:[%s225_s19 + $0x3c] sm:$0xf] %v277_v15 }
  0x26 PF: > { %p1039_p7 = scmp.ge.s32.totalorder %s1363_s27, 1  ;;  %p342_p8 = scmp.lt.s32.totalorder %s1363_s27, 5 }
  0x28   : > { %p343_p9 = pnand %p1039_p7, %p342_p8 }
  0x29   : > { %s349_s20 = sand.u32 (!%p343_p9), 1, %s1339_s21   ;;  %s1041_s30 = sshll.u32 (!%p343_p9), %s1347_s23, 4 }
  0x2a   : > { %346 = sbr.rel (%p343_p9) target bundleno = 634 (0x27a), region = 81  ;;  %s1040_s7 = sshll.u32 (!%p343_p9), %s349_s20, 6 }
  0x2b   : > { %p385_p10 = scmp.lt.s32.totalorder (!%p343_p9), %s1041_s30, 31  ;;  %s1043_s8 = sshll.u32 (!%p343_p9), %s1351_s24, 4 }
  0x2c   : > { %p391_p11 = scmp.lt.s32.totalorder (!%p343_p9), %s1043_s8, 31  ;;  %s1494_s21 = scalar_lea.vmem (!%p343_p9), [#allocation3], %s1040_s7 }
  0x2d   : > { %p1045_p12 = scmp.ne.s32.totalorder (!%p343_p9), %s1347_s23, 0 }
  0x2f   : > { %s1625_s30 = smov (!%p385_p10, %s1041_s30), 31  ;;  %s1627_s8 = smov (!%p391_p11, %s1043_s8), 31 }
  0x30   : > { %s1042_s9 = sshll.u32 %s1625_s30, 2  ;;  %s1044_s14 = sshll.u32 %s1627_s8, 3 }
  0x31   : > { %s1487_s13 = scalar_lea.vmem %s1606_s1, %s1042_s9  ;;  %s1492_s17 = scalar_lea.vmem %s1611_s6, %s1044_s14 }
  0x32   : > { %399 = sbr.rel (%p1045_p12) target bundleno = 72 (0x48), region = 89 }
  0x37   : > { %v1365_v16 = vmov 0.0  }
  0x38   : > { %400 = vst [vmem:[#allocation2 + $0x30] sm:$0xff] %v1365_v16 }
  0x39   : > { %401 = vst [vmem:[#allocation2] sm:$0xff] %v1365_v16 }
  0x3a   : > { %402 = vst [vmem:[#allocation2 + $0x58] sm:$0xff] %v1365_v16 }
  0x3b   : > { %403 = vst [vmem:[#allocation2 + $0x18] sm:$0xff] %v1365_v16 }
  0x3c   : > { %404 = vst [vmem:[#allocation2 + $0x50] sm:$0xff] %v1365_v16 }
  0x3d   : > { %405 = vst [vmem:[#allocation2 + $0x68] sm:$0xff] %v1365_v16 }
  0x3e   : > { %406 = vst [vmem:[#allocation2 + $0x8] sm:$0xff] %v1365_v16 }
  0x3f   : > { %407 = vst [vmem:[#allocation2 + $0x48] sm:$0xff] %v1365_v16 }
  0x40   : > { %408 = vst [vmem:[#allocation2 + $0x40] sm:$0xff] %v1365_v16 }
  0x41   : > { %409 = vst [vmem:[#allocation2 + $0x20] sm:$0xff] %v1365_v16 }
  0x42   : > { %410 = vst [vmem:[#allocation2 + $0x10] sm:$0xff] %v1365_v16 }
  0x43   : > { %411 = vst [vmem:[#allocation2 + $0x38] sm:$0xff] %v1365_v16 }
  0x44   : > { %412 = vst [vmem:[#allocation2 + $0x60] sm:$0xff] %v1365_v16 }
  0x45   : > { %413 = vst [vmem:[#allocation2 + $0x70] sm:$0xff] %v1365_v16 }
  0x46   : > { %414 = vst [vmem:[#allocation2 + $0x78] sm:$0xff] %v1365_v16 }
  0x47   : > { %415 = vst [vmem:[#allocation2 + $0x28] sm:$0xff] %v1365_v16 }
  0x48 PF: > { %v1193_v17 = vld [vmem:[%s1487_s13 + $0x38] sm:$0xff]  ;;  %v1192_v18 = vld [vmem:[%s1487_s13 + $0x30] sm:$0xff]  ;;  %v1191_v19 = vld [vmem:[%s1487_s13 + $0x28] sm:$0xff]  ;;  %p1110_p13 = scmp.ne.s32.totalorder %s1347_s23, 1 }
  0x49   : > { %560 = vmatpush.bf16.msra.mxu0 %v1193_v17  ;;  %1210 = vmatpush.bf16.msra.mxu1 %v1193_v17  ;;  %v1190_v20 = vld [vmem:[%s1487_s13 + $0x20] sm:$0xff]  ;;  %v1189_v21 = vld [vmem:[%s1487_s13 + $0x18] sm:$0xff]  ;;  %v1188_v22 = vld [vmem:[%s1487_s13 + $0x10] sm:$0xff] }
  0x4a   : > { %1211 = vmatpush.bf16.msra.mxu2 %v1193_v17  ;;  %1212 = vmatpush.bf16.msra.mxu3 %v1193_v17  ;;  %v1187_v23 = vld [vmem:[%s1487_s13 + $0x8] sm:$0xff]  ;;  %v1186_v24 = vld [vmem:[%s1487_s13] sm:$0xff]  ;;  %v1180_v26 = vld [vmem:[%s1494_s21 + $0x10] sm:$0xff] }
  0x4b   : > { %v1178_v25 = vld [vmem:[%s1494_s21] sm:$0xff]  ;;  %v1184_v28 = vld [vmem:[%s1494_s21 + $0x30] sm:$0xff]  ;;  %v1179_v29 = vld [vmem:[%s1494_s21 + $0x8] sm:$0xff] }
  0x4c   : > { %v1182_v27 = vld [vmem:[%s1494_s21 + $0x20] sm:$0xff]  ;;  %v1181_v30 = vld [vmem:[%s1494_s21 + $0x18] sm:$0xff]  ;;  %v1183_v31 = vld [vmem:[%s1494_s21 + $0x28] sm:$0xff] }
  0x4d   : > { %561 = vmatpush.bf16.msra.mxu0 %v1192_v18  ;;  %1213 = vmatpush.bf16.msra.mxu1 %v1192_v18  ;;  %v1185_v32 = vld [vmem:[%s1494_s21 + $0x38] sm:$0xff]  ;;  %v416_v33 = vld [vmem:[#allocation2 + $0x30] sm:$0xff]  ;;  %v424_v39 = vld [vmem:[#allocation2 + $0x40] sm:$0xff] }
  0x4e   : > { %1214 = vmatpush.bf16.msra.mxu2 %v1192_v18  ;;  %1215 = vmatpush.bf16.msra.mxu3 %v1192_v18  ;;  %v420_v34 = vld [vmem:[#allocation2 + $0x50] sm:$0xff]  ;;  %v428_v40 = vld [vmem:[#allocation2 + $0x60] sm:$0xff]  ;;  %v421_v42 = vld [vmem:[#allocation2 + $0x68] sm:$0xff] }
  0x4f   : > { %v417_v41 = vld [vmem:[#allocation2] sm:$0xff]  ;;  %v429_v52 = vld [vmem:[#allocation2 + $0x70] sm:$0xff]  ;;  %v418_v53 = vld [vmem:[#allocation2 + $0x58] sm:$0xff] }
  0x50   : > { %v425_v51 = vld [vmem:[#allocation2 + $0x20] sm:$0xff]  ;;  %v422_v54 = vld [vmem:[#allocation2 + $0x8] sm:$0xff]  ;;  %v426_v63 = vld [vmem:[#allocation2 + $0x10] sm:$0xff] }
  0x51   : > { %562 = vmatpush.bf16.msra.mxu0 %v1191_v19  ;;  %1216 = vmatpush.bf16.msra.mxu1 %v1191_v19  ;;  %v430_v0 = vld [vmem:[#allocation2 + $0x78] sm:$0xff]  ;;  %v423_v2 = vld [vmem:[#allocation2 + $0x48] sm:$0xff] }
  0x52   : > { %1217 = vmatpush.bf16.msra.mxu2 %v1191_v19  ;;  %1218 = vmatpush.bf16.msra.mxu3 %v1191_v19  ;;  %v419_v1 = vld [vmem:[#allocation2 + $0x18] sm:$0xff]  ;;  %v431_v12 = vld [vmem:[#allocation2 + $0x28] sm:$0xff] }
  0x53   : > { %v427_v11 = vld [vmem:[#allocation2 + $0x38] sm:$0xff] }
  0x55   : > { %563 = vmatpush.bf16.msra.mxu0 %v1190_v20  ;;  %1219 = vmatpush.bf16.msra.mxu1 %v1190_v20 }
  0x56   : > { %1220 = vmatpush.bf16.msra.mxu2 %v1190_v20  ;;  %1221 = vmatpush.bf16.msra.mxu3 %v1190_v20 }
  0x59   : > { %564 = vmatpush.bf16.msra.mxu0 %v1189_v21  ;;  %1222 = vmatpush.bf16.msra.mxu1 %v1189_v21 }
  0x5a   : > { %1223 = vmatpush.bf16.msra.mxu2 %v1189_v21  ;;  %1224 = vmatpush.bf16.msra.mxu3 %v1189_v21 }
  0x5d   : > { %565 = vmatpush.bf16.msra.mxu0 %v1188_v22  ;;  %1225 = vmatpush.bf16.msra.mxu1 %v1188_v22 }
  0x5e   : > { %1226 = vmatpush.bf16.msra.mxu2 %v1188_v22  ;;  %1227 = vmatpush.bf16.msra.mxu3 %v1188_v22 }
  0x61   : > { %566 = vmatpush.bf16.msra.mxu0 %v1187_v23  ;;  %1228 = vmatpush.bf16.msra.mxu1 %v1187_v23 }
  0x62   : > { %1229 = vmatpush.bf16.msra.mxu2 %v1187_v23  ;;  %1230 = vmatpush.bf16.msra.mxu3 %v1187_v23 }
  0x65   : > { %567 = vmatpush.bf16.msra.mxu0 %v1186_v24  ;;  %1231 = vmatpush.bf16.msra.mxu1 %v1186_v24 }
  0x66   : > { %1232 = vmatpush.bf16.msra.mxu2 %v1186_v24  ;;  %1233 = vmatpush.bf16.msra.mxu3 %v1186_v24 }
  0x68   : > { %568 = vmatmul.bf16.vlgmr.msra.gmra.mxu0 %v1178_v25  ;;  %578 = vmatmul.bf16.vlgmr.msra.gmra.mxu1 %v1180_v26 }
  0x69   : > { %588 = vmatmul.bf16.vlgmr.msra.gmra.mxu2 %v1182_v27  ;;  %598 = vmatmul.bf16.vlgmr.msra.gmra.mxu3 %v1184_v28 }
  0x78   : > { %573 = vmatmul.bf16.gmra.mxu0 %v1179_v29  ;;  %583 = vmatmul.bf16.gmra.mxu1 %v1181_v30 }
  0x79   : > { %593 = vmatmul.bf16.gmra.mxu2 %v1183_v31  ;;  %603 = vmatmul.bf16.gmra.mxu3 %v1185_v32 }
  0xe5   : > { %v569_v35 = vpop.f32.mrf.mxu0  ;;  %v579_v36 = vpop.f32.mrf.mxu1 }
  0xe6   : > { %v609_v37 = vadd.f32 %v569_v35, %v416_v33  ;;  %v613_v38 = vadd.f32 %v579_v36, %v420_v34 }
  0xe8   : > { %625 = vst [vmem:[#allocation2 + $0x30] sm:$0xff] %v609_v37 }
  0xe9   : > { %629 = vst [vmem:[#allocation2 + $0x50] sm:$0xff] %v613_v38 }
  0xec   : > { %v589_v43 = vpop.f32.mrf.mxu2  ;;  %v599_v44 = vpop.f32.mrf.mxu3 }
  0xed   : > { %v617_v45 = vadd.f32 %v589_v43, %v424_v39  ;;  %v621_v46 = vadd.f32 %v599_v44, %v428_v40  ;;  %v571_v47 = vpop.f32.mrf.mxu0  ;;  %v581_v48 = vpop.f32.mrf.mxu1 }
  0xee   : > { %v610_v49 = vadd.f32 %v571_v47, %v417_v41  ;;  %v614_v50 = vadd.f32 %v581_v48, %v421_v42 }
  0xef   : > { %633 = vst [vmem:[#allocation2 + $0x40] sm:$0xff] %v617_v45 }
  0xf0   : > { %637 = vst [vmem:[#allocation2 + $0x60] sm:$0xff] %v621_v46 }
  0xf1   : > { %626 = vst [vmem:[#allocation2] sm:$0xff] %v610_v49 }
  0xf2   : > { %630 = vst [vmem:[#allocation2 + $0x68] sm:$0xff] %v614_v50 }
  0xf4   : > { %v591_v55 = vpop.f32.mrf.mxu2  ;;  %v601_v56 = vpop.f32.mrf.mxu3 }
  0xf5   : > { %v618_v57 = vadd.f32 %v591_v55, %v425_v51  ;;  %v622_v58 = vadd.f32 %v601_v56, %v429_v52  ;;  %v574_v59 = vpop.f32.mrf.mxu0  ;;  %v584_v60 = vpop.f32.mrf.mxu1 }
  0xf6   : > { %v611_v61 = vadd.f32 %v574_v59, %v418_v53  ;;  %v615_v62 = vadd.f32 %v584_v60, %v422_v54 }
  0xf7   : > { %634 = vst [vmem:[#allocation2 + $0x20] sm:$0xff] %v618_v57 }
  0xf8   : > { %638 = vst [vmem:[#allocation2 + $0x70] sm:$0xff] %v622_v58 }
  0xf9   : > { %627 = vst [vmem:[#allocation2 + $0x58] sm:$0xff] %v611_v61 }
  0xfa   : > { %631 = vst [vmem:[#allocation2 + $0x8] sm:$0xff] %v615_v62 }
  0xfc   : > { %v594_v3 = vpop.f32.mrf.mxu2  ;;  %v604_v4 = vpop.f32.mrf.mxu3 }
  0xfd   : > { %v619_v5 = vadd.f32 %v594_v3, %v426_v63  ;;  %v623_v6 = vadd.f32 %v604_v4, %v430_v0  ;;  %v576_v7 = vpop.f32.mrf.mxu0  ;;  %v586_v8 = vpop.f32.mrf.mxu1 }
  0xfe   : > { %v612_v9 = vadd.f32 %v576_v7, %v419_v1  ;;  %v616_v10 = vadd.f32 %v586_v8, %v423_v2 }
  0xff   : > { %635 = vst [vmem:[#allocation2 + $0x10] sm:$0xff] %v619_v5 }
 0x100   : > { %639 = vst [vmem:[#allocation2 + $0x78] sm:$0xff] %v623_v6 }
 0x101   : > { %628 = vst [vmem:[#allocation2 + $0x18] sm:$0xff] %v612_v9 }
 0x102   : > { %632 = vst [vmem:[#allocation2 + $0x48] sm:$0xff] %v616_v10 }
 0x104   : > { %v596_v13 = vpop.f32.mrf.mxu2  ;;  %v606_v14 = vpop.f32.mrf.mxu3  ;;  %644 = sbr.rel (%p1110_p13) target bundleno = 634 (0x27a), region = 93 }
 0x105   : > { %v620_v15 = vadd.f32 %v596_v13, %v427_v11  ;;  %v624_v16 = vadd.f32 %v606_v14, %v431_v12 }
 0x107   : > { %636 = vst [vmem:[#allocation2 + $0x38] sm:$0xff] %v620_v15 }
 0x108   : > { %640 = vst [vmem:[#allocation2 + $0x28] sm:$0xff] %v624_v16 }
 0x109   : > { %v1201_v17 = vld [vmem:[%s1607_s2 + $0x38] sm:$0xff]  ;;  %v1200_v18 = vld [vmem:[%s1607_s2 + $0x30] sm:$0xff]  ;;  %v1199_v19 = vld [vmem:[%s1607_s2 + $0x28] sm:$0xff] }
 0x10a   : > { %737 = vmatpush.bf16.msra.mxu0 %v1201_v17  ;;  %1234 = vmatpush.bf16.msra.mxu2 %v1201_v17  ;;  %v1198_v20 = vld [vmem:[%s1607_s2 + $0x20] sm:$0xff]  ;;  %v1197_v21 = vld [vmem:[%s1607_s2 + $0x18] sm:$0xff]  ;;  %v1196_v22 = vld [vmem:[%s1607_s2 + $0x10] sm:$0xff] }
 0x10b   : > { %v1195_v23 = vld [vmem:[%s1607_s2 + $0x8] sm:$0xff]  ;;  %v1194_v24 = vld [vmem:[%s1607_s2] sm:$0xff]  ;;  %v645_v25 = vld [vmem:[#allocation2 + $0x30] sm:$0xff] }
 0x10c   : > { %v646_v26 = vld [vmem:[#allocation2] sm:$0xff]  ;;  %v647_v31 = vld [vmem:[#allocation2 + $0x58] sm:$0xff]  ;;  %v655_v33 = vld [vmem:[#allocation2 + $0x10] sm:$0xff] }
 0x10d   : > { %v653_v27 = vld [vmem:[#allocation2 + $0x40] sm:$0xff]  ;;  %v661_v29 = vpack.c.bf16 %v646_v26, %v645_v25  ;;  %v648_v32 = vld [vmem:[#allocation2 + $0x18] sm:$0xff]  ;;  %v1208_v38 = vld [vmem:[%s1609_s4 + $0x30] sm:$0xff] }
 0x10e   : > { %738 = vmatpush.bf16.msra.mxu0 %v1200_v18  ;;  %1235 = vmatpush.bf16.msra.mxu2 %v1200_v18  ;;  %v654_v28 = vld [vmem:[#allocation2 + $0x20] sm:$0xff]  ;;  %v656_v34 = vld [vmem:[#allocation2 + $0x38] sm:$0xff]  ;;  %v662_v35 = vpack.c.bf16 %v648_v32, %v647_v31  ;;  %v1207_v39 = vld [vmem:[%s1609_s4 + $0x28] sm:$0xff] }
 0x10f   : > { %v665_v30 = vpack.c.bf16 %v654_v28, %v653_v27  ;;  %v666_v36 = vpack.c.bf16 %v656_v34, %v655_v33  ;;  %v1209_v37 = vld [vmem:[%s1609_s4 + $0x38] sm:$0xff]  ;;  %v649_v40 = vld [vmem:[#allocation2 + $0x50] sm:$0xff]  ;;  %v650_v41 = vld [vmem:[#allocation2 + $0x68] sm:$0xff] }
 0x110   : > { %878 = vmatpush.bf16.msra.mxu1 %v1209_v37  ;;  %1242 = vmatpush.bf16.msra.mxu3 %v1209_v37  ;;  %v657_v42 = vld [vmem:[#allocation2 + $0x60] sm:$0xff]  ;;  %v658_v43 = vld [vmem:[#allocation2 + $0x70] sm:$0xff]  ;;  %v663_v45 = vpack.c.bf16 %v650_v41, %v649_v40  ;;  %v651_v47 = vld [vmem:[#allocation2 + $0x8] sm:$0xff] }
 0x111   : > { %v1206_v44 = vld [vmem:[%s1609_s4 + $0x20] sm:$0xff]  ;;  %v667_v46 = vpack.c.bf16 %v658_v43, %v657_v42  ;;  %v652_v48 = vld [vmem:[#allocation2 + $0x48] sm:$0xff]  ;;  %v659_v49 = vld [vmem:[#allocation2 + $0x78] sm:$0xff] }
 0x112   : > { %739 = vmatpush.bf16.msra.mxu0 %v1199_v19  ;;  %1236 = vmatpush.bf16.msra.mxu2 %v1199_v19  ;;  %v660_v50 = vld [vmem:[#allocation2 + $0x28] sm:$0xff]  ;;  %v664_v51 = vpack.c.bf16 %v652_v48, %v651_v47  ;;  %v1205_v53 = vld [vmem:[%s1609_s4 + $0x18] sm:$0xff]  ;;  %v1204_v54 = vld [vmem:[%s1609_s4 + $0x10] sm:$0xff] }
 0x113   : > { %v668_v52 = vpack.c.bf16 %v660_v50, %v659_v49  ;;  %v1203_v55 = vld [vmem:[%s1609_s4 + $0x8] sm:$0xff]  ;;  %v1202_v56 = vld [vmem:[%s1609_s4] sm:$0xff] }
 0x114   : > { %879 = vmatpush.bf16.msra.mxu1 %v1208_v38  ;;  %1243 = vmatpush.bf16.msra.mxu3 %v1208_v38  ;;  %v1307_v58 = vld [vmem:[%s1608_s3] ss:$0 sm:$0xff] }
 0x115   : > { %v1308_v50 = vld [vmem:[%s1610_s5] ss:$0 sm:$0xff] }
 0x116   : > { %740 = vmatpush.bf16.msra.mxu0 %v1198_v20  ;;  %1237 = vmatpush.bf16.msra.mxu2 %v1198_v20 }
 0x118   : > { %880 = vmatpush.bf16.msra.mxu1 %v1207_v39  ;;  %1244 = vmatpush.bf16.msra.mxu3 %v1207_v39 }
 0x11a   : > { %741 = vmatpush.bf16.msra.mxu0 %v1197_v21  ;;  %1238 = vmatpush.bf16.msra.mxu2 %v1197_v21 }
 0x11c   : > { %881 = vmatpush.bf16.msra.mxu1 %v1206_v44  ;;  %1245 = vmatpush.bf16.msra.mxu3 %v1206_v44 }
 0x11e   : > { %742 = vmatpush.bf16.msra.mxu0 %v1196_v22  ;;  %1239 = vmatpush.bf16.msra.mxu2 %v1196_v22 }
 0x120   : > { %882 = vmatpush.bf16.msra.mxu1 %v1205_v53  ;;  %1246 = vmatpush.bf16.msra.mxu3 %v1205_v53 }
 0x122   : > { %743 = vmatpush.bf16.msra.mxu0 %v1195_v23  ;;  %1240 = vmatpush.bf16.msra.mxu2 %v1195_v23 }
 0x124   : > { %883 = vmatpush.bf16.msra.mxu1 %v1204_v54  ;;  %1247 = vmatpush.bf16.msra.mxu3 %v1204_v54 }
 0x126   : > { %744 = vmatpush.bf16.msra.mxu0 %v1194_v24  ;;  %1241 = vmatpush.bf16.msra.mxu2 %v1194_v24 }
 0x128   : > { %884 = vmatpush.bf16.msra.mxu1 %v1203_v55  ;;  %1248 = vmatpush.bf16.msra.mxu3 %v1203_v55 }
 0x129   : > { %745 = vmatmul.bf16.vlgmr.msra.gmra.mxu0 %v661_v29  ;;  %765 = vmatmul.bf16.vlgmr.msra.gmra.mxu2 %v665_v30 }
 0x12c   : > { %885 = vmatpush.bf16.msra.mxu1 %v1202_v56  ;;  %1249 = vmatpush.bf16.msra.mxu3 %v1202_v56 }
 0x139   : > { %750 = vmatmul.bf16.gmra.mxu0 %v662_v35  ;;  %770 = vmatmul.bf16.gmra.mxu2 %v666_v36 }
 0x149   : > { %755 = vmatmul.bf16.gmra.mxu0 %v663_v45  ;;  %775 = vmatmul.bf16.gmra.mxu2 %v667_v46 }
 0x159   : > { %760 = vmatmul.bf16.gmra.mxu0 %v664_v51  ;;  %780 = vmatmul.bf16.gmra.mxu2 %v668_v52 }
 0x1a6   : > { %v746_v57 = vpop.f32.mrf.mxu0 }
 0x1a7   : > { %v747_v59 = vadd.f32 %v1307_v58, %v746_v57 }
 0x1a9   : > { %v786_v62 = vmax.f32 %v747_v59, 0.0 }
 0x1ac   : > { %v766_v60 = vpop.f32.mrf.mxu2 }
 0x1ad   : > { %v767_v1 = vadd.f32 %v1307_v58, %v766_v60 }
 0x1ae   : > { %v748_v61 = vpop.f32.mrf.mxu0 }
 0x1af   : > { %v749_v63 = vadd.f32 %v1307_v58, %v748_v61  ;;  %v794_v6 = vmax.f32 %v767_v1, 0.0 }
 0x1b1   : > { %v787_v0 = vmax.f32 %v749_v63, 0.0 }
 0x1b3   : > { %v802_v2 = vpack.c.bf16 %v787_v0, %v786_v62 }
 0x1b4   : > { %v768_v3 = vpop.f32.mrf.mxu2 }
 0x1b5   : > { %v769_v4 = vadd.f32 %v1307_v58, %v768_v3  ;;  %886 = vmatmul.bf16.vlgmr.msra.gmra.mxu1 %v802_v2 }
 0x1b6   : > { %v751_v5 = vpop.f32.mrf.mxu0 }
 0x1b7   : > { %v795_v7 = vmax.f32 %v769_v4, 0.0  ;;  %v752_v9 = vadd.f32 %v1307_v58, %v751_v5 }
 0x1b9   : > { %v806_v8 = vpack.c.bf16 %v795_v7, %v794_v6  ;;  %v788_v12 = vmax.f32 %v752_v9, 0.0 }
 0x1bb   : > { %906 = vmatmul.bf16.vlgmr.msra.gmra.mxu3 %v806_v8 }
 0x1bc   : > { %v771_v10 = vpop.f32.mrf.mxu2 }
 0x1bd   : > { %v772_v15 = vadd.f32 %v1307_v58, %v771_v10 }
 0x1be   : > { %v753_v11 = vpop.f32.mrf.mxu0 }
 0x1bf   : > { %v754_v13 = vadd.f32 %v1307_v58, %v753_v11  ;;  %v796_v20 = vmax.f32 %v772_v15, 0.0 }
 0x1c1   : > { %v789_v14 = vmax.f32 %v754_v13, 0.0 }
 0x1c3   : > { %v803_v16 = vpack.c.bf16 %v789_v14, %v788_v12 }
 0x1c4   : > { %v773_v17 = vpop.f32.mrf.mxu2 }
 0x1c5   : > { %v774_v18 = vadd.f32 %v1307_v58, %v773_v17  ;;  %891 = vmatmul.bf16.gmra.mxu1 %v803_v16 }
 0x1c6   : > { %v756_v19 = vpop.f32.mrf.mxu0 }
 0x1c7   : > { %v797_v21 = vmax.f32 %v774_v18, 0.0  ;;  %v757_v23 = vadd.f32 %v1307_v58, %v756_v19 }
 0x1c9   : > { %v807_v22 = vpack.c.bf16 %v797_v21, %v796_v20  ;;  %v790_v26 = vmax.f32 %v757_v23, 0.0 }
 0x1cb   : > { %911 = vmatmul.bf16.gmra.mxu3 %v807_v22 }
 0x1cc   : > { %v776_v24 = vpop.f32.mrf.mxu2 }
 0x1cd   : > { %v777_v29 = vadd.f32 %v1307_v58, %v776_v24 }
 0x1ce   : > { %v758_v25 = vpop.f32.mrf.mxu0 }
 0x1cf   : > { %v759_v27 = vadd.f32 %v1307_v58, %v758_v25  ;;  %v798_v34 = vmax.f32 %v777_v29, 0.0 }
 0x1d1   : > { %v791_v28 = vmax.f32 %v759_v27, 0.0 }
 0x1d3   : > { %v804_v30 = vpack.c.bf16 %v791_v28, %v790_v26 }
 0x1d4   : > { %v778_v31 = vpop.f32.mrf.mxu2 }
 0x1d5   : > { %v779_v32 = vadd.f32 %v1307_v58, %v778_v31  ;;  %896 = vmatmul.bf16.gmra.mxu1 %v804_v30 }
 0x1d6   : > { %v761_v33 = vpop.f32.mrf.mxu0 }
 0x1d7   : > { %v799_v35 = vmax.f32 %v779_v32, 0.0  ;;  %v762_v37 = vadd.f32 %v1307_v58, %v761_v33 }
 0x1d9   : > { %v808_v36 = vpack.c.bf16 %v799_v35, %v798_v34  ;;  %v792_v40 = vmax.f32 %v762_v37, 0.0 }
 0x1db   : > { %916 = vmatmul.bf16.gmra.mxu3 %v808_v36 }
 0x1dc   : > { %v781_v38 = vpop.f32.mrf.mxu2 }
 0x1dd   : > { %v782_v43 = vadd.f32 %v1307_v58, %v781_v38 }
 0x1de   : > { %v763_v39 = vpop.f32.mrf.mxu0 }
 0x1df   : > { %v764_v41 = vadd.f32 %v1307_v58, %v763_v39  ;;  %v800_v47 = vmax.f32 %v782_v43, 0.0 }
 0x1e1   : > { %v793_v42 = vmax.f32 %v764_v41, 0.0 }
 0x1e3   : > { %v805_v44 = vpack.c.bf16 %v793_v42, %v792_v40 }
 0x1e4   : > { %v783_v45 = vpop.f32.mrf.mxu2 }
 0x1e5   : > { %v784_v46 = vadd.f32 %v1307_v58, %v783_v45  ;;  %901 = vmatmul.bf16.gmra.mxu1 %v805_v44 }
 0x1e7   : > { %v801_v48 = vmax.f32 %v784_v46, 0.0 }
 0x1e9   : > { %v809_v49 = vpack.c.bf16 %v801_v48, %v800_v47 }
 0x1eb   : > { %921 = vmatmul.bf16.gmra.mxu3 %v809_v49 }
 0x232   : > { %v887_v51 = vpop.f32.mrf.mxu1 }
 0x233   : > { %v888_v52 = vadd.f32 %v1308_v50, %v887_v51 }
 0x235   : > { %927 = vst [vmem:[%s1492_s17] sm:$0xff] %v888_v52 }
 0x23a   : > { %v889_v53 = vpop.f32.mrf.mxu1 }
 0x23b   : > { %v890_v54 = vadd.f32 %v1308_v50, %v889_v53 }
 0x23d   : > { %928 = vst [vmem:[%s1492_s17 + $0x8] sm:$0xff] %v890_v54 }
 0x23e   : > { %v907_v55 = vpop.f32.mrf.mxu3 }
 0x23f   : > { %v908_v56 = vadd.f32 %v1308_v50, %v907_v55 }
 0x241   : > { %935 = vst [vmem:[%s1492_s17 + $0x40] sm:$0xff] %v908_v56 }
 0x242   : > { %v892_v57 = vpop.f32.mrf.mxu1 }
 0x243   : > { %v893_v58 = vadd.f32 %v1308_v50, %v892_v57 }
 0x245   : > { %929 = vst [vmem:[%s1492_s17 + $0x10] sm:$0xff] %v893_v58 }
 0x246   : > { %v909_v59 = vpop.f32.mrf.mxu3 }
 0x247   : > { %v910_v60 = vadd.f32 %v1308_v50, %v909_v59 }
 0x249   : > { %936 = vst [vmem:[%s1492_s17 + $0x48] sm:$0xff] %v910_v60 }
 0x24a   : > { %v894_v61 = vpop.f32.mrf.mxu1 }
 0x24b   : > { %v895_v62 = vadd.f32 %v1308_v50, %v894_v61 }
 0x24d   : > { %930 = vst [vmem:[%s1492_s17 + $0x18] sm:$0xff] %v895_v62 }
 0x24e   : > { %v912_v63 = vpop.f32.mrf.mxu3 }
 0x24f   : > { %v913_v0 = vadd.f32 %v1308_v50, %v912_v63 }
 0x251   : > { %937 = vst [vmem:[%s1492_s17 + $0x50] sm:$0xff] %v913_v0 }
 0x252   : > { %v897_v1 = vpop.f32.mrf.mxu1 }
 0x253   : > { %v898_v2 = vadd.f32 %v1308_v50, %v897_v1 }
 0x255   : > { %931 = vst [vmem:[%s1492_s17 + $0x20] sm:$0xff] %v898_v2 }
 0x256   : > { %v914_v3 = vpop.f32.mrf.mxu3 }
 0x257   : > { %v915_v4 = vadd.f32 %v1308_v50, %v914_v3 }
 0x259   : > { %938 = vst [vmem:[%s1492_s17 + $0x58] sm:$0xff] %v915_v4 }
 0x25a   : > { %v899_v5 = vpop.f32.mrf.mxu1 }
 0x25b   : > { %v900_v6 = vadd.f32 %v1308_v50, %v899_v5 }
 0x25d   : > { %932 = vst [vmem:[%s1492_s17 + $0x28] sm:$0xff] %v900_v6 }
 0x25e   : > { %v917_v7 = vpop.f32.mrf.mxu3 }
 0x25f   : > { %v918_v8 = vadd.f32 %v1308_v50, %v917_v7 }
 0x261   : > { %939 = vst [vmem:[%s1492_s17 + $0x60] sm:$0xff] %v918_v8 }
 0x262   : > { %v902_v9 = vpop.f32.mrf.mxu1 }
 0x263   : > { %v903_v10 = vadd.f32 %v1308_v50, %v902_v9 }
 0x265   : > { %933 = vst [vmem:[%s1492_s17 + $0x30] sm:$0xff] %v903_v10 }
 0x266   : > { %v919_v11 = vpop.f32.mrf.mxu3 }
 0x267   : > { %v920_v12 = vadd.f32 %v1308_v50, %v919_v11 }
 0x269   : > { %940 = vst [vmem:[%s1492_s17 + $0x68] sm:$0xff] %v920_v12 }
 0x26a   : > { %v904_v13 = vpop.f32.mrf.mxu1 }
 0x26b   : > { %v905_v14 = vadd.f32 %v1308_v50, %v904_v13 }
 0x26d   : > { %934 = vst [vmem:[%s1492_s17 + $0x38] sm:$0xff] %v905_v14 }
 0x26e   : > { %v922_v15 = vpop.f32.mrf.mxu3 }
 0x26f   : > { %v923_v16 = vadd.f32 %v1308_v50, %v922_v15 }
 0x271   : > { %941 = vst [vmem:[%s1492_s17 + $0x70] sm:$0xff] %v923_v16 }
 0x276   : > { %v924_v17 = vpop.f32.mrf.mxu3 }
 0x277   : > { %v925_v18 = vadd.f32 %v1308_v50, %v924_v17 }
 0x279   : > { %942 = vst [vmem:[%s1492_s17 + $0x78] sm:$0xff] %v925_v18 }
 0x27a PF: > { %s16_s27 = sadd.s32 1, %s1363_s27   ;;  %s1612_s21 = smov %s1343_s22 }
 0x27b   : > { %p13_p0 = scmp.ge.s32.totalorder %s16_s27, 6   ;;  %s1613_s22 = smov %s1452_s10 }
 0x27c   : > { %s1614_s23 = smov %s1355_s25  ;;  %s1615_s24 = smov %s1359_s26 }
 0x27d   : > { %s1616_s25 = smov %s1619_s28  ;;  %s1617_s26 = smov %s1623_s29 }
 0x27e   :  { %15 = sbr.rel (!%p13_p0) target bundleno = 4 (0x4), region = 131 }

</bundles_post_ra>
